<compile_context>
chip_gen: v7x
topology: tpu7x:2x2x1
jax: 0.10.0
libtpu: 0.0.40
codegen_flags: <defaults>
</compile_context>

<pallas_src>
import math

import jax
import jax.numpy as jnp
from jax import lax
from jax.experimental import pallas as pl
from jax.experimental.pallas import tpu as pltpu  # noqa: F401  (kept for parity)

# --- model hyper-parameters (small, consistent with the module's __init__) ---
NTOKEN = 50
NINP = 32
NHEAD = 2
NHID = 64
NLAYERS = 2
SEQ = 8
BATCH = 2
HEAD_DIM = NINP // NHEAD
LN_EPS = 1e-5
ROWS = SEQ * BATCH            # flattened (seq-major) activation rows = 16
BD_ROWS = NHEAD * ROWS        # rows of the head-blocked attention layout = 32
NTOKEN_PAD = 64               # one-hot / embedding-table row padding
VOCAB_PAD = 128               # lane-dense decoder output width (>= NTOKEN)

# --- packed-slab row offsets -------------------------------------------------
TAB_PE, TAB_MASK, TAB_EMB = 0, ROWS, ROWS + BD_ROWS      # constants slab rows
MLP_WO, MLP_W1, MLP_W2 = 0, NINP, 2 * NINP               # wmlp slab rows
BQ_ROW, BK_ROW, BV_ROW = 0, 2, 4                         # bias slab rows
BO_ROW, BF1_ROW, BF2_ROW = 6, 7, 8
G1_ROW, B1_ROW, G2_ROW, B2_ROW = 9, 10, 11, 12
BIAS_ROWS = 16


def _layer_norm(x, gamma, beta):
    mu = jnp.mean(x, axis=-1, keepdims=True)
    var = jnp.mean((x - mu) ** 2, axis=-1, keepdims=True)
    return (x - mu) * lax.rsqrt(var + LN_EPS) * gamma + beta


def _qkv_idx(l, proj, h):
    # flat index into the (NLAYERS*3*NHEAD, NINP, HEAD_DIM) qkv weight slab
    return (l * 3 + proj) * NHEAD + h


# ----------------------------------------------------------------------------
# Single fused kernel: embedding + PE + NLAYERS encoder layers + decoder.
# Everything (weights + activations ~150 KB) lives in VMEM; no grid, no scratch.
# ----------------------------------------------------------------------------
def fused_transformer_kernel(ids_ref, tab_ref, wqkv_ref, wmlp_ref,
                             bias_ref, wdec_ref, o_ref):
    pe = tab_ref[TAB_PE:TAB_PE + ROWS, :]                 # (16, 32)
    mask = tab_ref[TAB_MASK:TAB_MASK + BD_ROWS, :]        # (32, 32) additive
    emb = tab_ref[TAB_EMB:TAB_EMB + NTOKEN_PAD, :]        # (64, 32) pre-scaled

    # --- embedding lookup as an exact one-hot matmul (keeps gather in-kernel)
    ids = ids_ref[...]                                    # (16, 1) int32
    tok = lax.broadcasted_iota(jnp.int32, (ROWS, NTOKEN_PAD), 1)
    onehot = (ids == tok).astype(jnp.float32)             # (16, 64)
    # sqrt(NINP) is already folded into the embedding table on the host.
    x = jnp.dot(onehot, emb, preferred_element_type=jnp.float32) + pe
    # dropout layers are identity in eval mode.

    for l in range(NLAYERS):                              # static unroll
        # --- per-head q/k/v projections: independent small matmuls, no lane
        #     slicing of a 96-wide qkv result (Wq, bq pre-scaled by 1/sqrt(hd))
        def proj(p_idx, b_row, h):
            return (jnp.dot(x, wqkv_ref[_qkv_idx(l, p_idx, h), :, :],
                            preferred_element_type=jnp.float32)
                    + bias_ref[l, b_row + h:b_row + h + 1, 0:HEAD_DIM])

        q_bd = jnp.concatenate([proj(0, BQ_ROW, h) for h in range(NHEAD)], 0)
        k_bd = jnp.concatenate([proj(1, BK_ROW, h) for h in range(NHEAD)], 0)
        v_bd = jnp.concatenate([proj(2, BV_ROW, h) for h in range(NHEAD)], 0)

        # --- ONE block-diagonal score matmul over all (batch, head) pairs;
        #     the precomputed mask is -inf across heads/batches + causal within
        s = lax.dot_general(q_bd, k_bd, (((1,), (1,)), ((), ())),
                            preferred_element_type=jnp.float32) + mask
        # no max-subtraction: scores are small & bounded here, exp(-inf) == 0
        p = jnp.exp(s)
        p = p * pl.reciprocal(jnp.sum(p, axis=-1, keepdims=True), approx=True)
        attn_bd = jnp.dot(p, v_bd, preferred_element_type=jnp.float32)  # (32,16)

        # --- output projection: per-head accumulation from sublane-aligned
        #     slices (no VMEM scratch, no lane-offset masked stores)
        attn = bias_ref[l, BO_ROW:BO_ROW + 1, 0:NINP]
        for h in range(NHEAD):
            attn = attn + jnp.dot(
                attn_bd[h * ROWS:(h + 1) * ROWS, :],
                wmlp_ref[l, MLP_WO + h * HEAD_DIM:MLP_WO + (h + 1) * HEAD_DIM,
                         0:NINP],
                preferred_element_type=jnp.float32)
        x = _layer_norm(x + attn,
                        bias_ref[l, G1_ROW:G1_ROW + 1, 0:NINP],
                        bias_ref[l, B1_ROW:B1_ROW + 1, 0:NINP])

        # --- feed-forward network (linear -> relu -> linear), post-norm
        h1 = jnp.maximum(
            jnp.dot(x, wmlp_ref[l, MLP_W1:MLP_W1 + NINP, :],
                    preferred_element_type=jnp.float32)
            + bias_ref[l, BF1_ROW:BF1_ROW + 1, :], 0.0)
        ff = (jnp.dot(h1, wmlp_ref[l, MLP_W2:MLP_W2 + NHID, 0:NINP],
                      preferred_element_type=jnp.float32)
              + bias_ref[l, BF2_ROW:BF2_ROW + 1, 0:NINP])
        x = _layer_norm(x + ff,
                        bias_ref[l, G2_ROW:G2_ROW + 1, 0:NINP],
                        bias_ref[l, B2_ROW:B2_ROW + 1, 0:NINP])

    # --- decoder to a lane-dense (128-wide) padded vocab; host slices to 50
    o_ref[...] = (jnp.dot(x, wdec_ref[0:NINP, :],
                          preferred_element_type=jnp.float32)
                  + wdec_ref[NINP:NINP + 1, :])


# ----------------------------------------------------------------------------
# Plain-JAX glue: parameter init, positional encoding, mask, slab packing.
# ----------------------------------------------------------------------------
def positional_encoding(max_len, d_model):
    position = jnp.arange(max_len, dtype=jnp.float32)[:, None]
    div_term = jnp.exp(jnp.arange(0, d_model, 2, dtype=jnp.float32)
                       * (-math.log(10000.0) / d_model))
    ang = position * div_term
    pe = jnp.zeros((max_len, d_model), dtype=jnp.float32)
    pe = pe.at[:, 0::2].set(jnp.sin(ang))
    pe = pe.at[:, 1::2].set(jnp.cos(ang))
    return pe


def generate_square_subsequent_mask(sz):
    keep = jnp.tril(jnp.ones((sz, sz), dtype=bool))
    return jnp.where(keep, 0.0, -jnp.inf).astype(jnp.float32)


def build_bd_mask(src_mask):
    """(32, 32) additive mask for the head-blocked layout row = h*16 + s*B + b."""
    idx = jnp.arange(BD_ROWS)
    h = idx // ROWS
    s = (idx % ROWS) // BATCH
    b = idx % BATCH
    same = (h[:, None] == h[None, :]) & (b[:, None] == b[None, :])
    base = src_mask[s[:, None], s[None, :]]
    return jnp.where(same, base, -jnp.inf).astype(jnp.float32)


def init_params(key):
    def u(k, shape, a=0.1):
        return jax.random.uniform(k, shape, jnp.float32, -a, a)

    ks = iter(jax.random.split(key, 40))
    p = {
        "emb": u(next(ks), (NTOKEN, NINP)),            # Embedding uniform(-.1,.1)
        "wd": u(next(ks), (NINP, NTOKEN)),             # decoder weight
        "bd": jnp.zeros((NTOKEN,), jnp.float32),       # decoder bias zeroed
        "pe": positional_encoding(5000, NINP),         # max_len=5000
    }

    def per_layer(shape, a=0.1):
        return jnp.stack([u(next(ks), shape, a) for _ in range(NLAYERS)])

    p["wq"] = per_layer((NINP, NINP)); p["wk"] = per_layer((NINP, NINP))
    p["wv"] = per_layer((NINP, NINP)); p["wo"] = per_layer((NINP, NINP))
    p["w1"] = per_layer((NINP, NHID)); p["w2"] = per_layer((NHID, NINP))
    # small non-zero biases / LN perturbations to exercise the full wiring
    p["bq"] = per_layer((NINP,), 0.05); p["bk"] = per_layer((NINP,), 0.05)
    p["bv"] = per_layer((NINP,), 0.05); p["bo"] = per_layer((NINP,), 0.05)
    p["bf1"] = per_layer((NHID,), 0.05); p["bf2"] = per_layer((NINP,), 0.05)
    p["g1"] = 1.0 + per_layer((NINP,), 0.05); p["b1"] = per_layer((NINP,), 0.05)
    p["g2"] = 1.0 + per_layer((NINP,), 0.05); p["b2"] = per_layer((NINP,), 0.05)
    return p


def pack_params(p, src_mask):
    """Pack raw params + constants into a handful of DMA-friendly slabs."""
    scale = 1.0 / math.sqrt(HEAD_DIM)

    # constants slab: PE tile | block-diagonal mask | pre-scaled embedding
    pe_flat = jnp.repeat(p["pe"][:SEQ], BATCH, axis=0)                 # (16, 32)
    mask_bd = build_bd_mask(src_mask)                                  # (32, 32)
    emb_pad = (jnp.zeros((NTOKEN_PAD, NINP), jnp.float32)
               .at[:NTOKEN, :].set(p["emb"] * math.sqrt(NINP)))        # (64, 32)
    tab = jnp.concatenate([pe_flat, mask_bd, emb_pad], axis=0)         # (112, 32)

    # per-head q/k/v projection weights, q pre-scaled by 1/sqrt(head_dim)
    def split_heads(w):  # (L, NINP, NINP) -> (L, NHEAD, NINP, HEAD_DIM)
        return w.reshape(NLAYERS, NINP, NHEAD, HEAD_DIM).transpose(0, 2, 1, 3)

    wqkv = jnp.stack([split_heads(p["wq"]) * scale,
                      split_heads(p["wk"]),
                      split_heads(p["wv"])], axis=1)
    wqkv = wqkv.reshape(NLAYERS * 3 * NHEAD, NINP, HEAD_DIM)           # (12,32,16)

    # Wo | W1 | W2 slab, stacked along sublanes, common lane width NHID
    wmlp = jnp.zeros((NLAYERS, 2 * NINP + NHID, NHID), jnp.float32)
    wmlp = wmlp.at[:, MLP_WO:MLP_WO + NINP, 0:NINP].set(p["wo"])
    wmlp = wmlp.at[:, MLP_W1:MLP_W1 + NINP, :].set(p["w1"])
    wmlp = wmlp.at[:, MLP_W2:MLP_W2 + NHID, 0:NINP].set(p["w2"])

    # bias / LayerNorm slab
    bias = jnp.zeros((NLAYERS, BIAS_ROWS, NHID), jnp.float32)
    bias = bias.at[:, BQ_ROW:BQ_ROW + NHEAD, 0:HEAD_DIM].set(
        (p["bq"] * scale).reshape(NLAYERS, NHEAD, HEAD_DIM))
    bias = bias.at[:, BK_ROW:BK_ROW + NHEAD, 0:HEAD_DIM].set(
        p["bk"].reshape(NLAYERS, NHEAD, HEAD_DIM))
    bias = bias.at[:, BV_ROW:BV_ROW + NHEAD, 0:HEAD_DIM].set(
        p["bv"].reshape(NLAYERS, NHEAD, HEAD_DIM))
    bias = bias.at[:, BO_ROW, 0:NINP].set(p["bo"])
    bias = bias.at[:, BF1_ROW, :].set(p["bf1"])
    bias = bias.at[:, BF2_ROW, 0:NINP].set(p["bf2"])
    bias = bias.at[:, G1_ROW, 0:NINP].set(p["g1"])
    bias = bias.at[:, B1_ROW, 0:NINP].set(p["b1"])
    bias = bias.at[:, G2_ROW, 0:NINP].set(p["g2"])
    bias = bias.at[:, B2_ROW, 0:NINP].set(p["b2"])

    # decoder slab: padded weight rows 0:32, bias row 32
    wdec = jnp.zeros((NINP + 8, VOCAB_PAD), jnp.float32)
    wdec = wdec.at[0:NINP, 0:NTOKEN].set(p["wd"])
    wdec = wdec.at[NINP, 0:NTOKEN].set(p["bd"])

    return {"tab": tab, "wqkv": wqkv, "wmlp": wmlp, "bias": bias, "wdec": wdec}


@jax.jit
def transformer_forward(src, packed):
    # src: (S, N) int32 token ids, seq-first like nn.Transformer.
    ids = src.reshape(ROWS, 1).astype(jnp.int32)          # seq-major, no transpose
    logits = pl.pallas_call(
        fused_transformer_kernel,
        out_shape=jax.ShapeDtypeStruct((ROWS, VOCAB_PAD), jnp.float32),
    )(ids, packed["tab"], packed["wqkv"], packed["wmlp"],
      packed["bias"], packed["wdec"])
    return logits.reshape(SEQ, BATCH, VOCAB_PAD)[:, :, :NTOKEN]   # (S, N, ntoken)


# ----------------------------------------------------------------------------
# Pure-JAX reference (for correctness check only), uses the raw parameters.
# ----------------------------------------------------------------------------
def reference_forward(src, src_mask, p):
    S, N = src.shape
    hp = lax.Precision.HIGHEST
    x = p["emb"][src] * math.sqrt(NINP) + p["pe"][:S][:, None, :]
    for l in range(NLAYERS):
        q = jnp.einsum("snd,de->sne", x, p["wq"][l], precision=hp) + p["bq"][l]
        k = jnp.einsum("snd,de->sne", x, p["wk"][l], precision=hp) + p["bk"][l]
        v = jnp.einsum("snd,de->sne", x, p["wv"][l], precision=hp) + p["bv"][l]
        split = lambda t: t.reshape(S, N, NHEAD, HEAD_DIM)
        qh, kh, vh = split(q), split(k), split(v)
        s = jnp.einsum("snhd,tnhd->nhst", qh, kh,
                       precision=hp) / math.sqrt(HEAD_DIM)
        s = s + src_mask[None, None, :, :]
        pa = jax.nn.softmax(s, axis=-1)
        av = jnp.einsum("nhst,tnhd->snhd", pa, vh,
                        precision=hp).reshape(S, N, NINP)
        attn = jnp.einsum("snd,de->sne", av, p["wo"][l],
                          precision=hp) + p["bo"][l]
        x = _layer_norm(x + attn, p["g1"][l], p["b1"][l])
        h1 = jnp.maximum(jnp.einsum("snd,dh->snh", x, p["w1"][l],
                                    precision=hp) + p["bf1"][l], 0.0)
        ff = jnp.einsum("snh,hd->snd", h1, p["w2"][l],
                        precision=hp) + p["bf2"][l]
        x = _layer_norm(x + ff, p["g2"][l], p["b2"][l])
    return jnp.einsum("snd,dv->snv", x, p["wd"], precision=hp) + p["bd"]


if __name__ == "__main__":
    key = jax.random.PRNGKey(0)
    k_src, k_par = jax.random.split(key)
    src = jax.random.randint(k_src, (SEQ, BATCH), 0, NTOKEN, dtype=jnp.int32)
    src_mask = generate_square_subsequent_mask(SEQ)
    params = init_params(k_par)
    packed = pack_params(params, src_mask)     # once, outside the jitted forward

    out = transformer_forward(src, packed)
    out = jax.block_until_ready(out)

    assert out.shape == (SEQ, BATCH, NTOKEN), out.shape
    assert bool(jnp.all(jnp.isfinite(out)))

    ref = reference_forward(src, src_mask, params)
    err = float(jnp.max(jnp.abs(out - ref)))
    assert err < 5e-2, f"max |kernel - ref| = {err}"

    print("KERNEL_OK")
</pallas_src>

<mosaic_0001>
module attributes {stable_mosaic.version = 11 : i64} {
  func.func @fused_transformer_kernel(%arg0: memref<16x1xi32, #tpu.memory_space<vmem>>, %arg1: memref<112x32xf32, #tpu.memory_space<vmem>>, %arg2: memref<12x32x16xf32, #tpu.memory_space<vmem>>, %arg3: memref<2x128x64xf32, #tpu.memory_space<vmem>>, %arg4: memref<2x16x64xf32, #tpu.memory_space<vmem>>, %arg5: memref<40x128xf32, #tpu.memory_space<vmem>>, %arg6: memref<16x128xf32, #tpu.memory_space<vmem>>) attributes {dimension_semantics = [], scalar_prefetch = 0 : i64, scratch_operands = 0 : i64, tpu.core_type = #tpu.core_type<tc>} {
    %c0 = arith.constant 0 : index
    %c0_0 = arith.constant 0 : index
    %0 = vector.load %arg1[%c0, %c0_0] : memref<112x32xf32, #tpu.memory_space<vmem>>, vector<16x32xf32>
    %c16 = arith.constant 16 : index
    %c0_1 = arith.constant 0 : index
    %1 = vector.load %arg1[%c16, %c0_1] : memref<112x32xf32, #tpu.memory_space<vmem>>, vector<32x32xf32>
    %c48 = arith.constant 48 : index
    %c0_2 = arith.constant 0 : index
    %2 = vector.load %arg1[%c48, %c0_2] : memref<112x32xf32, #tpu.memory_space<vmem>>, vector<64x32xf32>
    %c0_3 = arith.constant 0 : index
    %c0_4 = arith.constant 0 : index
    %3 = vector.load %arg0[%c0_3, %c0_4] : memref<16x1xi32, #tpu.memory_space<vmem>>, vector<16x1xi32>
    %4 = tpu.iota {dimensions = array<i32: 1>} : vector<16x64xi32>
    %5 = vector.broadcast %3 : vector<16x1xi32> to vector<16x64xi32>
    %6 = arith.cmpi eq, %5, %4 : vector<16x64xi32>
    %7 = arith.extui %6 : vector<16x64xi1> to vector<16x64xi32>
    %8 = arith.sitofp %7 : vector<16x64xi32> to vector<16x64xf32>
    %cst = arith.constant dense<0.000000e+00> : vector<16x32xf32>
    %9 = tpu.matmul %8, %2, %cst {dimension_numbers = #tpu.dot_dimension_numbers<[1], [0], [0], [1], [0, 0, 1, 1], [], []>} : vector<16x64xf32>, vector<64x32xf32>, vector<16x32xf32> -> vector<16x32xf32>
    %10 = arith.addf %9, %0 : vector<16x32xf32>
    %c0_5 = arith.constant 0 : index
    %c0_6 = arith.constant 0 : index
    %c0_7 = arith.constant 0 : index
    %11 = vector.load %arg2[%c0_5, %c0_6, %c0_7] : memref<12x32x16xf32, #tpu.memory_space<vmem>>, vector<1x32x16xf32>
    %12 = vector.shape_cast %11 : vector<1x32x16xf32> to vector<32x16xf32>
    %cst_8 = arith.constant dense<0.000000e+00> : vector<16x16xf32>
    %13 = tpu.matmul %10, %12, %cst_8 {dimension_numbers = #tpu.dot_dimension_numbers<[1], [0], [0], [1], [0, 0, 1, 1], [], []>} : vector<16x32xf32>, vector<32x16xf32>, vector<16x16xf32> -> vector<16x16xf32>
    %c0_9 = arith.constant 0 : index
    %c0_10 = arith.constant 0 : index
    %c0_11 = arith.constant 0 : index
    %14 = vector.load %arg4[%c0_9, %c0_10, %c0_11] : memref<2x16x64xf32, #tpu.memory_space<vmem>>, vector<1x1x16xf32>
    %15 = vector.shape_cast %14 : vector<1x1x16xf32> to vector<1x16xf32>
    %16 = vector.broadcast %15 : vector<1x16xf32> to vector<16x16xf32>
    %17 = arith.addf %13, %16 : vector<16x16xf32>
    %c1 = arith.constant 1 : index
    %c0_12 = arith.constant 0 : index
    %c0_13 = arith.constant 0 : index
    %18 = vector.load %arg2[%c1, %c0_12, %c0_13] : memref<12x32x16xf32, #tpu.memory_space<vmem>>, vector<1x32x16xf32>
    %19 = vector.shape_cast %18 : vector<1x32x16xf32> to vector<32x16xf32>
    %cst_14 = arith.constant dense<0.000000e+00> : vector<16x16xf32>
    %20 = tpu.matmul %10, %19, %cst_14 {dimension_numbers = #tpu.dot_dimension_numbers<[1], [0], [0], [1], [0, 0, 1, 1], [], []>} : vector<16x32xf32>, vector<32x16xf32>, vector<16x16xf32> -> vector<16x16xf32>
    %c0_15 = arith.constant 0 : index
    %c1_16 = arith.constant 1 : index
    %c0_17 = arith.constant 0 : index
    %21 = vector.load %arg4[%c0_15, %c1_16, %c0_17] : memref<2x16x64xf32, #tpu.memory_space<vmem>>, vector<1x1x16xf32>
    %22 = vector.shape_cast %21 : vector<1x1x16xf32> to vector<1x16xf32>
    %23 = vector.broadcast %22 : vector<1x16xf32> to vector<16x16xf32>
    %24 = arith.addf %20, %23 : vector<16x16xf32>
    %25 = tpu.concatenate %17, %24 in 0 : vector<16x16xf32>, vector<16x16xf32> -> vector<32x16xf32>
    %c2 = arith.constant 2 : index
    %c0_18 = arith.constant 0 : index
    %c0_19 = arith.constant 0 : index
    %26 = vector.load %arg2[%c2, %c0_18, %c0_19] : memref<12x32x16xf32, #tpu.memory_space<vmem>>, vector<1x32x16xf32>
    %27 = vector.shape_cast %26 : vector<1x32x16xf32> to vector<32x16xf32>
    %cst_20 = arith.constant dense<0.000000e+00> : vector<16x16xf32>
    %28 = tpu.matmul %10, %27, %cst_20 {dimension_numbers = #tpu.dot_dimension_numbers<[1], [0], [0], [1], [0, 0, 1, 1], [], []>} : vector<16x32xf32>, vector<32x16xf32>, vector<16x16xf32> -> vector<16x16xf32>
    %c0_21 = arith.constant 0 : index
    %c2_22 = arith.constant 2 : index
    %c0_23 = arith.constant 0 : index
    %29 = vector.load %arg4[%c0_21, %c2_22, %c0_23] : memref<2x16x64xf32, #tpu.memory_space<vmem>>, vector<1x1x16xf32>
    %30 = vector.shape_cast %29 : vector<1x1x16xf32> to vector<1x16xf32>
    %31 = vector.broadcast %30 : vector<1x16xf32> to vector<16x16xf32>
    %32 = arith.addf %28, %31 : vector<16x16xf32>
    %c3 = arith.constant 3 : index
    %c0_24 = arith.constant 0 : index
    %c0_25 = arith.constant 0 : index
    %33 = vector.load %arg2[%c3, %c0_24, %c0_25] : memref<12x32x16xf32, #tpu.memory_space<vmem>>, vector<1x32x16xf32>
    %34 = vector.shape_cast %33 : vector<1x32x16xf32> to vector<32x16xf32>
    %cst_26 = arith.constant dense<0.000000e+00> : vector<16x16xf32>
    %35 = tpu.matmul %10, %34, %cst_26 {dimension_numbers = #tpu.dot_dimension_numbers<[1], [0], [0], [1], [0, 0, 1, 1], [], []>} : vector<16x32xf32>, vector<32x16xf32>, vector<16x16xf32> -> vector<16x16xf32>
    %c0_27 = arith.constant 0 : index
    %c3_28 = arith.constant 3 : index
    %c0_29 = arith.constant 0 : index
    %36 = vector.load %arg4[%c0_27, %c3_28, %c0_29] : memref<2x16x64xf32, #tpu.memory_space<vmem>>, vector<1x1x16xf32>
    %37 = vector.shape_cast %36 : vector<1x1x16xf32> to vector<1x16xf32>
    %38 = vector.broadcast %37 : vector<1x16xf32> to vector<16x16xf32>
    %39 = arith.addf %35, %38 : vector<16x16xf32>
    %40 = tpu.concatenate %32, %39 in 0 : vector<16x16xf32>, vector<16x16xf32> -> vector<32x16xf32>
    %c4 = arith.constant 4 : index
    %c0_30 = arith.constant 0 : index
    %c0_31 = arith.constant 0 : index
    %41 = vector.load %arg2[%c4, %c0_30, %c0_31] : memref<12x32x16xf32, #tpu.memory_space<vmem>>, vector<1x32x16xf32>
    %42 = vector.shape_cast %41 : vector<1x32x16xf32> to vector<32x16xf32>
    %cst_32 = arith.constant dense<0.000000e+00> : vector<16x16xf32>
    %43 = tpu.matmul %10, %42, %cst_32 {dimension_numbers = #tpu.dot_dimension_numbers<[1], [0], [0], [1], [0, 0, 1, 1], [], []>} : vector<16x32xf32>, vector<32x16xf32>, vector<16x16xf32> -> vector<16x16xf32>
    %c0_33 = arith.constant 0 : index
    %c4_34 = arith.constant 4 : index
    %c0_35 = arith.constant 0 : index
    %44 = vector.load %arg4[%c0_33, %c4_34, %c0_35] : memref<2x16x64xf32, #tpu.memory_space<vmem>>, vector<1x1x16xf32>
    %45 = vector.shape_cast %44 : vector<1x1x16xf32> to vector<1x16xf32>
    %46 = vector.broadcast %45 : vector<1x16xf32> to vector<16x16xf32>
    %47 = arith.addf %43, %46 : vector<16x16xf32>
    %c5 = arith.constant 5 : index
    %c0_36 = arith.constant 0 : index
    %c0_37 = arith.constant 0 : index
    %48 = vector.load %arg2[%c5, %c0_36, %c0_37] : memref<12x32x16xf32, #tpu.memory_space<vmem>>, vector<1x32x16xf32>
    %49 = vector.shape_cast %48 : vector<1x32x16xf32> to vector<32x16xf32>
    %cst_38 = arith.constant dense<0.000000e+00> : vector<16x16xf32>
    %50 = tpu.matmul %10, %49, %cst_38 {dimension_numbers = #tpu.dot_dimension_numbers<[1], [0], [0], [1], [0, 0, 1, 1], [], []>} : vector<16x32xf32>, vector<32x16xf32>, vector<16x16xf32> -> vector<16x16xf32>
    %c0_39 = arith.constant 0 : index
    %c5_40 = arith.constant 5 : index
    %c0_41 = arith.constant 0 : index
    %51 = vector.load %arg4[%c0_39, %c5_40, %c0_41] : memref<2x16x64xf32, #tpu.memory_space<vmem>>, vector<1x1x16xf32>
    %52 = vector.shape_cast %51 : vector<1x1x16xf32> to vector<1x16xf32>
    %53 = vector.broadcast %52 : vector<1x16xf32> to vector<16x16xf32>
    %54 = arith.addf %50, %53 : vector<16x16xf32>
    %55 = tpu.concatenate %47, %54 in 0 : vector<16x16xf32>, vector<16x16xf32> -> vector<32x16xf32>
    %cst_42 = arith.constant dense<0.000000e+00> : vector<32x32xf32>
    %56 = tpu.matmul %25, %40, %cst_42 {dimension_numbers = #tpu.dot_dimension_numbers<[1], [1], [0], [0], [0, 0, 1, 0], [], []>} : vector<32x16xf32>, vector<32x16xf32>, vector<32x32xf32> -> vector<32x32xf32>
    %57 = arith.addf %56, %1 : vector<32x32xf32>
    %58 = math.exp %57 : vector<32x32xf32>
    %cst_43 = arith.constant dense<0.000000e+00> : vector<32xf32>
    %59 = vector.multi_reduction <add>, %58, %cst_43 [1] : vector<32x32xf32> to vector<32xf32>
    %60 = vector.shape_cast %59 : vector<32xf32> to vector<32x1xf32>
    %61 = tpu.reciprocal %60 {approx = true} : vector<32x1xf32> -> vector<32x1xf32>
    %62 = vector.broadcast %61 : vector<32x1xf32> to vector<32x32xf32>
    %63 = arith.mulf %58, %62 : vector<32x32xf32>
    %cst_44 = arith.constant dense<0.000000e+00> : vector<32x16xf32>
    %64 = tpu.matmul %63, %55, %cst_44 {dimension_numbers = #tpu.dot_dimension_numbers<[1], [0], [0], [1], [0, 0, 1, 1], [], []>} : vector<32x32xf32>, vector<32x16xf32>, vector<32x16xf32> -> vector<32x16xf32>
    %c0_45 = arith.constant 0 : index
    %c6 = arith.constant 6 : index
    %c0_46 = arith.constant 0 : index
    %65 = vector.load %arg4[%c0_45, %c6, %c0_46] : memref<2x16x64xf32, #tpu.memory_space<vmem>>, vector<1x1x32xf32>
    %66 = vector.shape_cast %65 : vector<1x1x32xf32> to vector<1x32xf32>
    %67 = vector.extract_strided_slice %64 {offsets = [0, 0], sizes = [16, 16], strides = [1, 1]} : vector<32x16xf32> to vector<16x16xf32>
    %c0_47 = arith.constant 0 : index
    %c0_48 = arith.constant 0 : index
    %c0_49 = arith.constant 0 : index
    %68 = vector.load %arg3[%c0_47, %c0_48, %c0_49] : memref<2x128x64xf32, #tpu.memory_space<vmem>>, vector<1x16x32xf32>
    %69 = vector.shape_cast %68 : vector<1x16x32xf32> to vector<16x32xf32>
    %cst_50 = arith.constant dense<0.000000e+00> : vector<16x32xf32>
    %70 = tpu.matmul %67, %69, %cst_50 {dimension_numbers = #tpu.dot_dimension_numbers<[1], [0], [0], [1], [0, 0, 1, 1], [], []>} : vector<16x16xf32>, vector<16x32xf32>, vector<16x32xf32> -> vector<16x32xf32>
    %71 = vector.broadcast %66 : vector<1x32xf32> to vector<16x32xf32>
    %72 = arith.addf %71, %70 : vector<16x32xf32>
    %73 = vector.extract_strided_slice %64 {offsets = [16, 0], sizes = [16, 16], strides = [1, 1]} : vector<32x16xf32> to vector<16x16xf32>
    %c0_51 = arith.constant 0 : index
    %c16_52 = arith.constant 16 : index
    %c0_53 = arith.constant 0 : index
    %74 = vector.load %arg3[%c0_51, %c16_52, %c0_53] : memref<2x128x64xf32, #tpu.memory_space<vmem>>, vector<1x16x32xf32>
    %75 = vector.shape_cast %74 : vector<1x16x32xf32> to vector<16x32xf32>
    %cst_54 = arith.constant dense<0.000000e+00> : vector<16x32xf32>
    %76 = tpu.matmul %73, %75, %cst_54 {dimension_numbers = #tpu.dot_dimension_numbers<[1], [0], [0], [1], [0, 0, 1, 1], [], []>} : vector<16x16xf32>, vector<16x32xf32>, vector<16x32xf32> -> vector<16x32xf32>
    %77 = arith.addf %72, %76 : vector<16x32xf32>
    %78 = arith.addf %10, %77 : vector<16x32xf32>
    %c0_55 = arith.constant 0 : index
    %c9 = arith.constant 9 : index
    %c0_56 = arith.constant 0 : index
    %79 = vector.load %arg4[%c0_55, %c9, %c0_56] : memref<2x16x64xf32, #tpu.memory_space<vmem>>, vector<1x1x32xf32>
    %80 = vector.shape_cast %79 : vector<1x1x32xf32> to vector<1x32xf32>
    %c0_57 = arith.constant 0 : index
    %c10 = arith.constant 10 : index
    %c0_58 = arith.constant 0 : index
    %81 = vector.load %arg4[%c0_57, %c10, %c0_58] : memref<2x16x64xf32, #tpu.memory_space<vmem>>, vector<1x1x32xf32>
    %82 = vector.shape_cast %81 : vector<1x1x32xf32> to vector<1x32xf32>
    %cst_59 = arith.constant dense<0.000000e+00> : vector<16xf32>
    %83 = vector.multi_reduction <add>, %78, %cst_59 [1] : vector<16x32xf32> to vector<16xf32>
    %84 = vector.shape_cast %83 : vector<16xf32> to vector<16x1xf32>
    %cst_60 = arith.constant 3.200000e+01 : f32
    %85 = vector.broadcast %cst_60 : f32 to vector<16x1xf32>
    %86 = arith.divf %84, %85 : vector<16x1xf32>
    %87 = vector.broadcast %86 : vector<16x1xf32> to vector<16x32xf32>
    %88 = arith.subf %78, %87 : vector<16x32xf32>
    %89 = arith.mulf %88, %88 : vector<16x32xf32>
    %cst_61 = arith.constant dense<0.000000e+00> : vector<16xf32>
    %90 = vector.multi_reduction <add>, %89, %cst_61 [1] : vector<16x32xf32> to vector<16xf32>
    %91 = vector.shape_cast %90 : vector<16xf32> to vector<16x1xf32>
    %cst_62 = arith.constant 3.200000e+01 : f32
    %92 = vector.broadcast %cst_62 : f32 to vector<16x1xf32>
    %93 = arith.divf %91, %92 : vector<16x1xf32>
    %94 = vector.broadcast %86 : vector<16x1xf32> to vector<16x32xf32>
    %95 = arith.subf %78, %94 : vector<16x32xf32>
    %cst_63 = arith.constant 9.99999974E-6 : f32
    %96 = vector.broadcast %cst_63 : f32 to vector<16x1xf32>
    %97 = arith.addf %93, %96 : vector<16x1xf32>
    %98 = math.rsqrt %97 : vector<16x1xf32>
    %99 = vector.broadcast %98 : vector<16x1xf32> to vector<16x32xf32>
    %100 = arith.mulf %95, %99 : vector<16x32xf32>
    %101 = vector.broadcast %80 : vector<1x32xf32> to vector<16x32xf32>
    %102 = arith.mulf %100, %101 : vector<16x32xf32>
    %103 = vector.broadcast %82 : vector<1x32xf32> to vector<16x32xf32>
    %104 = arith.addf %102, %103 : vector<16x32xf32>
    %c0_64 = arith.constant 0 : index
    %c32 = arith.constant 32 : index
    %c0_65 = arith.constant 0 : index
    %105 = vector.load %arg3[%c0_64, %c32, %c0_65] : memref<2x128x64xf32, #tpu.memory_space<vmem>>, vector<1x32x64xf32>
    %106 = vector.shape_cast %105 : vector<1x32x64xf32> to vector<32x64xf32>
    %cst_66 = arith.constant dense<0.000000e+00> : vector<16x64xf32>
    %107 = tpu.matmul %104, %106, %cst_66 {dimension_numbers = #tpu.dot_dimension_numbers<[1], [0], [0], [1], [0, 0, 1, 1], [], []>} : vector<16x32xf32>, vector<32x64xf32>, vector<16x64xf32> -> vector<16x64xf32>
    %c0_67 = arith.constant 0 : index
    %c7 = arith.constant 7 : index
    %c0_68 = arith.constant 0 : index
    %108 = vector.load %arg4[%c0_67, %c7, %c0_68] : memref<2x16x64xf32, #tpu.memory_space<vmem>>, vector<1x1x64xf32>
    %109 = vector.shape_cast %108 : vector<1x1x64xf32> to vector<1x64xf32>
    %110 = vector.broadcast %109 : vector<1x64xf32> to vector<16x64xf32>
    %111 = arith.addf %107, %110 : vector<16x64xf32>
    %cst_69 = arith.constant 0.000000e+00 : f32
    %112 = vector.broadcast %cst_69 : f32 to vector<16x64xf32>
    %113 = arith.maximumf %111, %112 : vector<16x64xf32>
    %c0_70 = arith.constant 0 : index
    %c64 = arith.constant 64 : index
    %c0_71 = arith.constant 0 : index
    %114 = vector.load %arg3[%c0_70, %c64, %c0_71] : memref<2x128x64xf32, #tpu.memory_space<vmem>>, vector<1x64x32xf32>
    %115 = vector.shape_cast %114 : vector<1x64x32xf32> to vector<64x32xf32>
    %cst_72 = arith.constant dense<0.000000e+00> : vector<16x32xf32>
    %116 = tpu.matmul %113, %115, %cst_72 {dimension_numbers = #tpu.dot_dimension_numbers<[1], [0], [0], [1], [0, 0, 1, 1], [], []>} : vector<16x64xf32>, vector<64x32xf32>, vector<16x32xf32> -> vector<16x32xf32>
    %c0_73 = arith.constant 0 : index
    %c8 = arith.constant 8 : index
    %c0_74 = arith.constant 0 : index
    %117 = vector.load %arg4[%c0_73, %c8, %c0_74] : memref<2x16x64xf32, #tpu.memory_space<vmem>>, vector<1x1x32xf32>
    %118 = vector.shape_cast %117 : vector<1x1x32xf32> to vector<1x32xf32>
    %119 = vector.broadcast %118 : vector<1x32xf32> to vector<16x32xf32>
    %120 = arith.addf %116, %119 : vector<16x32xf32>
    %121 = arith.addf %104, %120 : vector<16x32xf32>
    %c0_75 = arith.constant 0 : index
    %c11 = arith.constant 11 : index
    %c0_76 = arith.constant 0 : index
    %122 = vector.load %arg4[%c0_75, %c11, %c0_76] : memref<2x16x64xf32, #tpu.memory_space<vmem>>, vector<1x1x32xf32>
    %123 = vector.shape_cast %122 : vector<1x1x32xf32> to vector<1x32xf32>
    %c0_77 = arith.constant 0 : index
    %c12 = arith.constant 12 : index
    %c0_78 = arith.constant 0 : index
    %124 = vector.load %arg4[%c0_77, %c12, %c0_78] : memref<2x16x64xf32, #tpu.memory_space<vmem>>, vector<1x1x32xf32>
    %125 = vector.shape_cast %124 : vector<1x1x32xf32> to vector<1x32xf32>
    %cst_79 = arith.constant dense<0.000000e+00> : vector<16xf32>
    %126 = vector.multi_reduction <add>, %121, %cst_79 [1] : vector<16x32xf32> to vector<16xf32>
    %127 = vector.shape_cast %126 : vector<16xf32> to vector<16x1xf32>
    %cst_80 = arith.constant 3.200000e+01 : f32
    %128 = vector.broadcast %cst_80 : f32 to vector<16x1xf32>
    %129 = arith.divf %127, %128 : vector<16x1xf32>
    %130 = vector.broadcast %129 : vector<16x1xf32> to vector<16x32xf32>
    %131 = arith.subf %121, %130 : vector<16x32xf32>
    %132 = arith.mulf %131, %131 : vector<16x32xf32>
    %cst_81 = arith.constant dense<0.000000e+00> : vector<16xf32>
    %133 = vector.multi_reduction <add>, %132, %cst_81 [1] : vector<16x32xf32> to vector<16xf32>
    %134 = vector.shape_cast %133 : vector<16xf32> to vector<16x1xf32>
    %cst_82 = arith.constant 3.200000e+01 : f32
    %135 = vector.broadcast %cst_82 : f32 to vector<16x1xf32>
    %136 = arith.divf %134, %135 : vector<16x1xf32>
    %137 = vector.broadcast %129 : vector<16x1xf32> to vector<16x32xf32>
    %138 = arith.subf %121, %137 : vector<16x32xf32>
    %cst_83 = arith.constant 9.99999974E-6 : f32
    %139 = vector.broadcast %cst_83 : f32 to vector<16x1xf32>
    %140 = arith.addf %136, %139 : vector<16x1xf32>
    %141 = math.rsqrt %140 : vector<16x1xf32>
    %142 = vector.broadcast %141 : vector<16x1xf32> to vector<16x32xf32>
    %143 = arith.mulf %138, %142 : vector<16x32xf32>
    %144 = vector.broadcast %123 : vector<1x32xf32> to vector<16x32xf32>
    %145 = arith.mulf %143, %144 : vector<16x32xf32>
    %146 = vector.broadcast %125 : vector<1x32xf32> to vector<16x32xf32>
    %147 = arith.addf %145, %146 : vector<16x32xf32>
    %c6_84 = arith.constant 6 : index
    %c0_85 = arith.constant 0 : index
    %c0_86 = arith.constant 0 : index
    %148 = vector.load %arg2[%c6_84, %c0_85, %c0_86] : memref<12x32x16xf32, #tpu.memory_space<vmem>>, vector<1x32x16xf32>
    %149 = vector.shape_cast %148 : vector<1x32x16xf32> to vector<32x16xf32>
    %cst_87 = arith.constant dense<0.000000e+00> : vector<16x16xf32>
    %150 = tpu.matmul %147, %149, %cst_87 {dimension_numbers = #tpu.dot_dimension_numbers<[1], [0], [0], [1], [0, 0, 1, 1], [], []>} : vector<16x32xf32>, vector<32x16xf32>, vector<16x16xf32> -> vector<16x16xf32>
    %c1_88 = arith.constant 1 : index
    %c0_89 = arith.constant 0 : index
    %c0_90 = arith.constant 0 : index
    %151 = vector.load %arg4[%c1_88, %c0_89, %c0_90] : memref<2x16x64xf32, #tpu.memory_space<vmem>>, vector<1x1x16xf32>
    %152 = vector.shape_cast %151 : vector<1x1x16xf32> to vector<1x16xf32>
    %153 = vector.broadcast %152 : vector<1x16xf32> to vector<16x16xf32>
    %154 = arith.addf %150, %153 : vector<16x16xf32>
    %c7_91 = arith.constant 7 : index
    %c0_92 = arith.constant 0 : index
    %c0_93 = arith.constant 0 : index
    %155 = vector.load %arg2[%c7_91, %c0_92, %c0_93] : memref<12x32x16xf32, #tpu.memory_space<vmem>>, vector<1x32x16xf32>
    %156 = vector.shape_cast %155 : vector<1x32x16xf32> to vector<32x16xf32>
    %cst_94 = arith.constant dense<0.000000e+00> : vector<16x16xf32>
    %157 = tpu.matmul %147, %156, %cst_94 {dimension_numbers = #tpu.dot_dimension_numbers<[1], [0], [0], [1], [0, 0, 1, 1], [], []>} : vector<16x32xf32>, vector<32x16xf32>, vector<16x16xf32> -> vector<16x16xf32>
    %c1_95 = arith.constant 1 : index
    %c1_96 = arith.constant 1 : index
    %c0_97 = arith.constant 0 : index
    %158 = vector.load %arg4[%c1_95, %c1_96, %c0_97] : memref<2x16x64xf32, #tpu.memory_space<vmem>>, vector<1x1x16xf32>
    %159 = vector.shape_cast %158 : vector<1x1x16xf32> to vector<1x16xf32>
    %160 = vector.broadcast %159 : vector<1x16xf32> to vector<16x16xf32>
    %161 = arith.addf %157, %160 : vector<16x16xf32>
    %162 = tpu.concatenate %154, %161 in 0 : vector<16x16xf32>, vector<16x16xf32> -> vector<32x16xf32>
    %c8_98 = arith.constant 8 : index
    %c0_99 = arith.constant 0 : index
    %c0_100 = arith.constant 0 : index
    %163 = vector.load %arg2[%c8_98, %c0_99, %c0_100] : memref<12x32x16xf32, #tpu.memory_space<vmem>>, vector<1x32x16xf32>
    %164 = vector.shape_cast %163 : vector<1x32x16xf32> to vector<32x16xf32>
    %cst_101 = arith.constant dense<0.000000e+00> : vector<16x16xf32>
    %165 = tpu.matmul %147, %164, %cst_101 {dimension_numbers = #tpu.dot_dimension_numbers<[1], [0], [0], [1], [0, 0, 1, 1], [], []>} : vector<16x32xf32>, vector<32x16xf32>, vector<16x16xf32> -> vector<16x16xf32>
    %c1_102 = arith.constant 1 : index
    %c2_103 = arith.constant 2 : index
    %c0_104 = arith.constant 0 : index
    %166 = vector.load %arg4[%c1_102, %c2_103, %c0_104] : memref<2x16x64xf32, #tpu.memory_space<vmem>>, vector<1x1x16xf32>
    %167 = vector.shape_cast %166 : vector<1x1x16xf32> to vector<1x16xf32>
    %168 = vector.broadcast %167 : vector<1x16xf32> to vector<16x16xf32>
    %169 = arith.addf %165, %168 : vector<16x16xf32>
    %c9_105 = arith.constant 9 : index
    %c0_106 = arith.constant 0 : index
    %c0_107 = arith.constant 0 : index
    %170 = vector.load %arg2[%c9_105, %c0_106, %c0_107] : memref<12x32x16xf32, #tpu.memory_space<vmem>>, vector<1x32x16xf32>
    %171 = vector.shape_cast %170 : vector<1x32x16xf32> to vector<32x16xf32>
    %cst_108 = arith.constant dense<0.000000e+00> : vector<16x16xf32>
    %172 = tpu.matmul %147, %171, %cst_108 {dimension_numbers = #tpu.dot_dimension_numbers<[1], [0], [0], [1], [0, 0, 1, 1], [], []>} : vector<16x32xf32>, vector<32x16xf32>, vector<16x16xf32> -> vector<16x16xf32>
    %c1_109 = arith.constant 1 : index
    %c3_110 = arith.constant 3 : index
    %c0_111 = arith.constant 0 : index
    %173 = vector.load %arg4[%c1_109, %c3_110, %c0_111] : memref<2x16x64xf32, #tpu.memory_space<vmem>>, vector<1x1x16xf32>
    %174 = vector.shape_cast %173 : vector<1x1x16xf32> to vector<1x16xf32>
    %175 = vector.broadcast %174 : vector<1x16xf32> to vector<16x16xf32>
    %176 = arith.addf %172, %175 : vector<16x16xf32>
    %177 = tpu.concatenate %169, %176 in 0 : vector<16x16xf32>, vector<16x16xf32> -> vector<32x16xf32>
    %c10_112 = arith.constant 10 : index
    %c0_113 = arith.constant 0 : index
    %c0_114 = arith.constant 0 : index
    %178 = vector.load %arg2[%c10_112, %c0_113, %c0_114] : memref<12x32x16xf32, #tpu.memory_space<vmem>>, vector<1x32x16xf32>
    %179 = vector.shape_cast %178 : vector<1x32x16xf32> to vector<32x16xf32>
    %cst_115 = arith.constant dense<0.000000e+00> : vector<16x16xf32>
    %180 = tpu.matmul %147, %179, %cst_115 {dimension_numbers = #tpu.dot_dimension_numbers<[1], [0], [0], [1], [0, 0, 1, 1], [], []>} : vector<16x32xf32>, vector<32x16xf32>, vector<16x16xf32> -> vector<16x16xf32>
    %c1_116 = arith.constant 1 : index
    %c4_117 = arith.constant 4 : index
    %c0_118 = arith.constant 0 : index
    %181 = vector.load %arg4[%c1_116, %c4_117, %c0_118] : memref<2x16x64xf32, #tpu.memory_space<vmem>>, vector<1x1x16xf32>
    %182 = vector.shape_cast %181 : vector<1x1x16xf32> to vector<1x16xf32>
    %183 = vector.broadcast %182 : vector<1x16xf32> to vector<16x16xf32>
    %184 = arith.addf %180, %183 : vector<16x16xf32>
    %c11_119 = arith.constant 11 : index
    %c0_120 = arith.constant 0 : index
    %c0_121 = arith.constant 0 : index
    %185 = vector.load %arg2[%c11_119, %c0_120, %c0_121] : memref<12x32x16xf32, #tpu.memory_space<vmem>>, vector<1x32x16xf32>
    %186 = vector.shape_cast %185 : vector<1x32x16xf32> to vector<32x16xf32>
    %cst_122 = arith.constant dense<0.000000e+00> : vector<16x16xf32>
    %187 = tpu.matmul %147, %186, %cst_122 {dimension_numbers = #tpu.dot_dimension_numbers<[1], [0], [0], [1], [0, 0, 1, 1], [], []>} : vector<16x32xf32>, vector<32x16xf32>, vector<16x16xf32> -> vector<16x16xf32>
    %c1_123 = arith.constant 1 : index
    %c5_124 = arith.constant 5 : index
    %c0_125 = arith.constant 0 : index
    %188 = vector.load %arg4[%c1_123, %c5_124, %c0_125] : memref<2x16x64xf32, #tpu.memory_space<vmem>>, vector<1x1x16xf32>
    %189 = vector.shape_cast %188 : vector<1x1x16xf32> to vector<1x16xf32>
    %190 = vector.broadcast %189 : vector<1x16xf32> to vector<16x16xf32>
    %191 = arith.addf %187, %190 : vector<16x16xf32>
    %192 = tpu.concatenate %184, %191 in 0 : vector<16x16xf32>, vector<16x16xf32> -> vector<32x16xf32>
    %cst_126 = arith.constant dense<0.000000e+00> : vector<32x32xf32>
    %193 = tpu.matmul %162, %177, %cst_126 {dimension_numbers = #tpu.dot_dimension_numbers<[1], [1], [0], [0], [0, 0, 1, 0], [], []>} : vector<32x16xf32>, vector<32x16xf32>, vector<32x32xf32> -> vector<32x32xf32>
    %194 = arith.addf %193, %1 : vector<32x32xf32>
    %195 = math.exp %194 : vector<32x32xf32>
    %cst_127 = arith.constant dense<0.000000e+00> : vector<32xf32>
    %196 = vector.multi_reduction <add>, %195, %cst_127 [1] : vector<32x32xf32> to vector<32xf32>
    %197 = vector.shape_cast %196 : vector<32xf32> to vector<32x1xf32>
    %198 = tpu.reciprocal %197 {approx = true} : vector<32x1xf32> -> vector<32x1xf32>
    %199 = vector.broadcast %198 : vector<32x1xf32> to vector<32x32xf32>
    %200 = arith.mulf %195, %199 : vector<32x32xf32>
    %cst_128 = arith.constant dense<0.000000e+00> : vector<32x16xf32>
    %201 = tpu.matmul %200, %192, %cst_128 {dimension_numbers = #tpu.dot_dimension_numbers<[1], [0], [0], [1], [0, 0, 1, 1], [], []>} : vector<32x32xf32>, vector<32x16xf32>, vector<32x16xf32> -> vector<32x16xf32>
    %c1_129 = arith.constant 1 : index
    %c6_130 = arith.constant 6 : index
    %c0_131 = arith.constant 0 : index
    %202 = vector.load %arg4[%c1_129, %c6_130, %c0_131] : memref<2x16x64xf32, #tpu.memory_space<vmem>>, vector<1x1x32xf32>
    %203 = vector.shape_cast %202 : vector<1x1x32xf32> to vector<1x32xf32>
    %204 = vector.extract_strided_slice %201 {offsets = [0, 0], sizes = [16, 16], strides = [1, 1]} : vector<32x16xf32> to vector<16x16xf32>
    %c1_132 = arith.constant 1 : index
    %c0_133 = arith.constant 0 : index
    %c0_134 = arith.constant 0 : index
    %205 = vector.load %arg3[%c1_132, %c0_133, %c0_134] : memref<2x128x64xf32, #tpu.memory_space<vmem>>, vector<1x16x32xf32>
    %206 = vector.shape_cast %205 : vector<1x16x32xf32> to vector<16x32xf32>
    %cst_135 = arith.constant dense<0.000000e+00> : vector<16x32xf32>
    %207 = tpu.matmul %204, %206, %cst_135 {dimension_numbers = #tpu.dot_dimension_numbers<[1], [0], [0], [1], [0, 0, 1, 1], [], []>} : vector<16x16xf32>, vector<16x32xf32>, vector<16x32xf32> -> vector<16x32xf32>
    %208 = vector.broadcast %203 : vector<1x32xf32> to vector<16x32xf32>
    %209 = arith.addf %208, %207 : vector<16x32xf32>
    %210 = vector.extract_strided_slice %201 {offsets = [16, 0], sizes = [16, 16], strides = [1, 1]} : vector<32x16xf32> to vector<16x16xf32>
    %c1_136 = arith.constant 1 : index
    %c16_137 = arith.constant 16 : index
    %c0_138 = arith.constant 0 : index
    %211 = vector.load %arg3[%c1_136, %c16_137, %c0_138] : memref<2x128x64xf32, #tpu.memory_space<vmem>>, vector<1x16x32xf32>
    %212 = vector.shape_cast %211 : vector<1x16x32xf32> to vector<16x32xf32>
    %cst_139 = arith.constant dense<0.000000e+00> : vector<16x32xf32>
    %213 = tpu.matmul %210, %212, %cst_139 {dimension_numbers = #tpu.dot_dimension_numbers<[1], [0], [0], [1], [0, 0, 1, 1], [], []>} : vector<16x16xf32>, vector<16x32xf32>, vector<16x32xf32> -> vector<16x32xf32>
    %214 = arith.addf %209, %213 : vector<16x32xf32>
    %215 = arith.addf %147, %214 : vector<16x32xf32>
    %c1_140 = arith.constant 1 : index
    %c9_141 = arith.constant 9 : index
    %c0_142 = arith.constant 0 : index
    %216 = vector.load %arg4[%c1_140, %c9_141, %c0_142] : memref<2x16x64xf32, #tpu.memory_space<vmem>>, vector<1x1x32xf32>
    %217 = vector.shape_cast %216 : vector<1x1x32xf32> to vector<1x32xf32>
    %c1_143 = arith.constant 1 : index
    %c10_144 = arith.constant 10 : index
    %c0_145 = arith.constant 0 : index
    %218 = vector.load %arg4[%c1_143, %c10_144, %c0_145] : memref<2x16x64xf32, #tpu.memory_space<vmem>>, vector<1x1x32xf32>
    %219 = vector.shape_cast %218 : vector<1x1x32xf32> to vector<1x32xf32>
    %cst_146 = arith.constant dense<0.000000e+00> : vector<16xf32>
    %220 = vector.multi_reduction <add>, %215, %cst_146 [1] : vector<16x32xf32> to vector<16xf32>
    %221 = vector.shape_cast %220 : vector<16xf32> to vector<16x1xf32>
    %cst_147 = arith.constant 3.200000e+01 : f32
    %222 = vector.broadcast %cst_147 : f32 to vector<16x1xf32>
    %223 = arith.divf %221, %222 : vector<16x1xf32>
    %224 = vector.broadcast %223 : vector<16x1xf32> to vector<16x32xf32>
    %225 = arith.subf %215, %224 : vector<16x32xf32>
    %226 = arith.mulf %225, %225 : vector<16x32xf32>
    %cst_148 = arith.constant dense<0.000000e+00> : vector<16xf32>
    %227 = vector.multi_reduction <add>, %226, %cst_148 [1] : vector<16x32xf32> to vector<16xf32>
    %228 = vector.shape_cast %227 : vector<16xf32> to vector<16x1xf32>
    %cst_149 = arith.constant 3.200000e+01 : f32
    %229 = vector.broadcast %cst_149 : f32 to vector<16x1xf32>
    %230 = arith.divf %228, %229 : vector<16x1xf32>
    %231 = vector.broadcast %223 : vector<16x1xf32> to vector<16x32xf32>
    %232 = arith.subf %215, %231 : vector<16x32xf32>
    %cst_150 = arith.constant 9.99999974E-6 : f32
    %233 = vector.broadcast %cst_150 : f32 to vector<16x1xf32>
    %234 = arith.addf %230, %233 : vector<16x1xf32>
    %235 = math.rsqrt %234 : vector<16x1xf32>
    %236 = vector.broadcast %235 : vector<16x1xf32> to vector<16x32xf32>
    %237 = arith.mulf %232, %236 : vector<16x32xf32>
    %238 = vector.broadcast %217 : vector<1x32xf32> to vector<16x32xf32>
    %239 = arith.mulf %237, %238 : vector<16x32xf32>
    %240 = vector.broadcast %219 : vector<1x32xf32> to vector<16x32xf32>
    %241 = arith.addf %239, %240 : vector<16x32xf32>
    %c1_151 = arith.constant 1 : index
    %c32_152 = arith.constant 32 : index
    %c0_153 = arith.constant 0 : index
    %242 = vector.load %arg3[%c1_151, %c32_152, %c0_153] : memref<2x128x64xf32, #tpu.memory_space<vmem>>, vector<1x32x64xf32>
    %243 = vector.shape_cast %242 : vector<1x32x64xf32> to vector<32x64xf32>
    %cst_154 = arith.constant dense<0.000000e+00> : vector<16x64xf32>
    %244 = tpu.matmul %241, %243, %cst_154 {dimension_numbers = #tpu.dot_dimension_numbers<[1], [0], [0], [1], [0, 0, 1, 1], [], []>} : vector<16x32xf32>, vector<32x64xf32>, vector<16x64xf32> -> vector<16x64xf32>
    %c1_155 = arith.constant 1 : index
    %c7_156 = arith.constant 7 : index
    %c0_157 = arith.constant 0 : index
    %245 = vector.load %arg4[%c1_155, %c7_156, %c0_157] : memref<2x16x64xf32, #tpu.memory_space<vmem>>, vector<1x1x64xf32>
    %246 = vector.shape_cast %245 : vector<1x1x64xf32> to vector<1x64xf32>
    %247 = vector.broadcast %246 : vector<1x64xf32> to vector<16x64xf32>
    %248 = arith.addf %244, %247 : vector<16x64xf32>
    %cst_158 = arith.constant 0.000000e+00 : f32
    %249 = vector.broadcast %cst_158 : f32 to vector<16x64xf32>
    %250 = arith.maximumf %248, %249 : vector<16x64xf32>
    %c1_159 = arith.constant 1 : index
    %c64_160 = arith.constant 64 : index
    %c0_161 = arith.constant 0 : index
    %251 = vector.load %arg3[%c1_159, %c64_160, %c0_161] : memref<2x128x64xf32, #tpu.memory_space<vmem>>, vector<1x64x32xf32>
    %252 = vector.shape_cast %251 : vector<1x64x32xf32> to vector<64x32xf32>
    %cst_162 = arith.constant dense<0.000000e+00> : vector<16x32xf32>
    %253 = tpu.matmul %250, %252, %cst_162 {dimension_numbers = #tpu.dot_dimension_numbers<[1], [0], [0], [1], [0, 0, 1, 1], [], []>} : vector<16x64xf32>, vector<64x32xf32>, vector<16x32xf32> -> vector<16x32xf32>
    %c1_163 = arith.constant 1 : index
    %c8_164 = arith.constant 8 : index
    %c0_165 = arith.constant 0 : index
    %254 = vector.load %arg4[%c1_163, %c8_164, %c0_165] : memref<2x16x64xf32, #tpu.memory_space<vmem>>, vector<1x1x32xf32>
    %255 = vector.shape_cast %254 : vector<1x1x32xf32> to vector<1x32xf32>
    %256 = vector.broadcast %255 : vector<1x32xf32> to vector<16x32xf32>
    %257 = arith.addf %253, %256 : vector<16x32xf32>
    %258 = arith.addf %241, %257 : vector<16x32xf32>
    %c1_166 = arith.constant 1 : index
    %c11_167 = arith.constant 11 : index
    %c0_168 = arith.constant 0 : index
    %259 = vector.load %arg4[%c1_166, %c11_167, %c0_168] : memref<2x16x64xf32, #tpu.memory_space<vmem>>, vector<1x1x32xf32>
    %260 = vector.shape_cast %259 : vector<1x1x32xf32> to vector<1x32xf32>
    %c1_169 = arith.constant 1 : index
    %c12_170 = arith.constant 12 : index
    %c0_171 = arith.constant 0 : index
    %261 = vector.load %arg4[%c1_169, %c12_170, %c0_171] : memref<2x16x64xf32, #tpu.memory_space<vmem>>, vector<1x1x32xf32>
    %262 = vector.shape_cast %261 : vector<1x1x32xf32> to vector<1x32xf32>
    %cst_172 = arith.constant dense<0.000000e+00> : vector<16xf32>
    %263 = vector.multi_reduction <add>, %258, %cst_172 [1] : vector<16x32xf32> to vector<16xf32>
    %264 = vector.shape_cast %263 : vector<16xf32> to vector<16x1xf32>
    %cst_173 = arith.constant 3.200000e+01 : f32
    %265 = vector.broadcast %cst_173 : f32 to vector<16x1xf32>
    %266 = arith.divf %264, %265 : vector<16x1xf32>
    %267 = vector.broadcast %266 : vector<16x1xf32> to vector<16x32xf32>
    %268 = arith.subf %258, %267 : vector<16x32xf32>
    %269 = arith.mulf %268, %268 : vector<16x32xf32>
    %cst_174 = arith.constant dense<0.000000e+00> : vector<16xf32>
    %270 = vector.multi_reduction <add>, %269, %cst_174 [1] : vector<16x32xf32> to vector<16xf32>
    %271 = vector.shape_cast %270 : vector<16xf32> to vector<16x1xf32>
    %cst_175 = arith.constant 3.200000e+01 : f32
    %272 = vector.broadcast %cst_175 : f32 to vector<16x1xf32>
    %273 = arith.divf %271, %272 : vector<16x1xf32>
    %274 = vector.broadcast %266 : vector<16x1xf32> to vector<16x32xf32>
    %275 = arith.subf %258, %274 : vector<16x32xf32>
    %cst_176 = arith.constant 9.99999974E-6 : f32
    %276 = vector.broadcast %cst_176 : f32 to vector<16x1xf32>
    %277 = arith.addf %273, %276 : vector<16x1xf32>
    %278 = math.rsqrt %277 : vector<16x1xf32>
    %279 = vector.broadcast %278 : vector<16x1xf32> to vector<16x32xf32>
    %280 = arith.mulf %275, %279 : vector<16x32xf32>
    %281 = vector.broadcast %260 : vector<1x32xf32> to vector<16x32xf32>
    %282 = arith.mulf %280, %281 : vector<16x32xf32>
    %283 = vector.broadcast %262 : vector<1x32xf32> to vector<16x32xf32>
    %284 = arith.addf %282, %283 : vector<16x32xf32>
    %c0_177 = arith.constant 0 : index
    %c0_178 = arith.constant 0 : index
    %285 = vector.load %arg5[%c0_177, %c0_178] : memref<40x128xf32, #tpu.memory_space<vmem>>, vector<32x128xf32>
    %cst_179 = arith.constant dense<0.000000e+00> : vector<16x128xf32>
    %286 = tpu.matmul %284, %285, %cst_179 {dimension_numbers = #tpu.dot_dimension_numbers<[1], [0], [0], [1], [0, 0, 1, 1], [], []>} : vector<16x32xf32>, vector<32x128xf32>, vector<16x128xf32> -> vector<16x128xf32>
    %c32_180 = arith.constant 32 : index
    %c0_181 = arith.constant 0 : index
    %287 = vector.load %arg5[%c32_180, %c0_181] : memref<40x128xf32, #tpu.memory_space<vmem>>, vector<1x128xf32>
    %288 = vector.broadcast %287 : vector<1x128xf32> to vector<16x128xf32>
    %289 = arith.addf %286, %288 : vector<16x128xf32>
    %c0_182 = arith.constant 0 : index
    %c0_183 = arith.constant 0 : index
    %290 = vector.load %arg6[%c0_182, %c0_183] : memref<16x128xf32, #tpu.memory_space<vmem>>, vector<16x128xf32>
    tpu.vector_store %arg6[%c0_182, %c0_183], %289 {strides = array<i32>} : memref<16x128xf32, #tpu.memory_space<vmem>>, vector<16x128xf32>,
    return
  }
}

</mosaic_0001>

<bundles_post_ra>
// kernel: transformer_forward.1
= control target key start
LH: loop header
LB: loop body
LE: loop exit
PB: predicated region body
PF: predicated region fallthrough
CT: control target
= control target key end

     0   :  { %v3592_v2 = vmov 0   ;;  %s4183_s0 = inlined_call_operand.vmem [shape: s32[16,1], index: 0, kind: input, shape index: {}]   ;;  %s4184_s1 = inlined_call_operand.vmem [shape: f32[112,32], index: 1, kind: input, shape index: {}]   ;;  %s4185_s2 = inlined_call_operand.vmem [shape: f32[12,32,16], index: 2, kind: input, shape index: {}]   ;;  %s4186_s3 = inlined_call_operand.vmem [shape: f32[2,128,64], index: 3, kind: input, shape index: {}]   ;;  %s4187_s4 = inlined_call_operand.vmem [shape: f32[2,16,64], index: 4, kind: input, shape index: {}]   ;;  %s4188_s5 = inlined_call_operand.vmem [shape: f32[40,128], index: 5, kind: input, shape index: {}]   ;;  %s4189_s6 = inlined_call_operand.hbm [shape: f32[16,128], index: 6, kind: output, shape index: {}]  }
   0x1   :  { %v38_v0 = vld [vmem:[%s4183_s0] sm:$0xff]  ;;  %v30_v1 = vld [vmem:[%s4184_s1 + $0x30] sm:$0xff]  ;;  %3519 = vset.pattern.permute.xlu0 %v3592_v2  ;;  %v31_v3 = vld [vmem:[%s4184_s1 + $0x38] sm:$0xff] }
   0x2   :  { %v32_v4 = vld [vmem:[%s4184_s1 + $0x40] sm:$0xff]  ;;  %v33_v5 = vld [vmem:[%s4184_s1 + $0x48] sm:$0xff]  ;;  %43 = vperm.xlu0 %3519, %v38_v0   ;;  %v3282_v7 = vpack.c.bf16 %v31_v3, %v30_v1  ;;  %v34_v9 = vld [vmem:[%s4184_s1 + $0x50] sm:$0xff] }
   0x3   :  { %v39_v6 = vld [vmem:[%s4183_s0 + $0x8] sm:$0xff]  ;;  %v3286_v8 = vpack.c.bf16 %v33_v5, %v32_v4  ;;  %v35_v10 = vld [vmem:[%s4184_s1 + $0x58] sm:$0xff] }
   0x4   :  { %11 = vsyncpa [#allocation3], 0  ;;  %3283 = vmatprep.subr.bf16.mxu0 %v3282_v7  ;;  %v3290_v11 = vpack.c.bf16 %v35_v10, %v34_v9  ;;  %v36_v12 = vld [vmem:[%s4184_s1 + $0x60] sm:$0xff]  ;;  %v37_v13 = vld [vmem:[%s4184_s1 + $0x68] sm:$0xff]  ;;  %v40_v21 = vlaneseq  ;;  %vm54_vm0 = vcmask 523264   ;;  %v3593_v24 = vmov 0.0  }
   0x5   :  { %3285 = vmatpush3.bf16.msra.mxu0 %v3282_v7  ;;  %v136_v14 = vld [vmem:[%s4185_s2] sm:$0xff]  ;;  %v137_v15 = vld [vmem:[%s4185_s2 + $0x8] sm:$0xff]  ;;  %v3294_v17 = vpack.c.bf16 %v37_v13, %v36_v12  ;;  %v138_v28 = vld [vmem:[%s4185_s2 + $0x10] sm:$0xff]  ;;  %vm145_vm3 = vcmask 261120   ;;  %vm652_vm4 = vcmask 130048   ;;  %s3594_s0 = smov [#allocation2]  }
   0x6   :  { %46 = vperm.xlu0 %3519, %v39_v6   ;;  %3287 = vmatprep.subr.bf16.mxu0 %v3286_v8  ;;  %v3298_v16 = vpack.c.bf16 %v137_v15, %v136_v14  ;;  %v2652_v18 = vld [vmem:[%s4185_s2 + $0x40] sm:$0xff]  ;;  %v2653_v19 = vld [vmem:[%s4185_s2 + $0x48] sm:$0xff]  ;;  %v41_v22 = vand.u32 127, %v40_v21  ;;  %v139_v29 = vld [vmem:[%s4185_s2 + $0x18] sm:$0xff]  ;;  %s2627_s15 = sshll.u32 %s3594_s0, 4  ;;  %s2628_s15 = int_to_ptr.vmem [resolvable:$true] %s2627_s15 }
   0x7   :  { %v3314_v20 = vpack.c.bf16 %v2653_v19, %v2652_v18  ;;  %v2654_v30 = vld [vmem:[%s4185_s2 + $0x50] sm:$0xff]  ;;  %v3302_v31 = vpack.c.bf16 %v139_v29, %v138_v28  ;;  %v2655_v32 = vld [vmem:[%s4185_s2 + $0x58] sm:$0xff]  ;;  %v2645_v34 = vld [vmem:[%s4185_s2 + $0x20] sm:$0xff]  ;;  %p3573_p1 = scmp.lt.s32.totalorder %s2628_s15, %s2628_s15 }
   0x8   :  { %3299 = vmatprep.subr.bf16.mxu1 %v3298_v16  ;;  %v3318_v33 = vpack.c.bf16 %v2655_v32, %v2654_v30  ;;  %v2646_v35 = vld [vmem:[%s4185_s2 + $0x28] sm:$0xff]  ;;  %v2666_v37 = vld [vmem:[%s4185_s2 + $0x80] sm:$0xff]  ;;  %v2647_v43 = vld [vmem:[%s4185_s2 + $0x30] sm:$0xff] }
   0x9   :  { %3289 = vmatpush3.bf16.msra.mxu0 %v3286_v8  ;;  %3301 = vmatpush3.bf16.msra.mxu1 %v3298_v16  ;;  %v3306_v36 = vpack.c.bf16 %v2646_v35, %v2645_v34  ;;  %v2667_v38 = vld [vmem:[%s4185_s2 + $0x88] sm:$0xff]  ;;  %v24_v40 = vld [vmem:[%s4184_s1] sm:$0xff]  ;;  %v2648_v45 = vld [vmem:[%s4185_s2 + $0x38] sm:$0xff] }
   0xa   :  { %3291 = vmatprep.subr.bf16.mxu0 %v3290_v11  ;;  %3303 = vmatprep.subr.bf16.mxu1 %v3302_v31  ;;  %v3330_v39 = vpack.c.bf16 %v2667_v38, %v2666_v37  ;;  %v25_v41 = vld [vmem:[%s4184_s1 + $0x8] sm:$0xff]  ;;  %v2668_v46 = vld [vmem:[%s4185_s2 + $0x90] sm:$0xff]  ;;  %v2669_v47 = vld [vmem:[%s4185_s2 + $0x98] sm:$0xff]  ;;  %v3310_v50 = vpack.c.bf16 %v2648_v45, %v2647_v43 }
   0xb   :  { %v3334_v51 = vpack.c.bf16 %v2669_v47, %v2668_v46  ;;  %v2659_v52 = vld [vmem:[%s4185_s2 + $0x60] sm:$0xff]  ;;  %v2660_v53 = vld [vmem:[%s4185_s2 + $0x68] sm:$0xff]  ;;  %v2661_v55 = vld [vmem:[%s4185_s2 + $0x70] sm:$0xff] }
   0xc   :  { %v3322_v54 = vpack.c.bf16 %v2660_v53, %v2659_v52  ;;  %v2662_v56 = vld [vmem:[%s4185_s2 + $0x78] sm:$0xff]  ;;  %v2673_v58 = vld [vmem:[%s4185_s2 + $0xa0] sm:$0xff]  ;;  %v2674_v59 = vld [vmem:[%s4185_s2 + $0xa8] sm:$0xff] }
   0xd   :  { %3293 = vmatpush3.bf16.msra.mxu0 %v3290_v11  ;;  %3305 = vmatpush3.bf16.msra.mxu1 %v3302_v31  ;;  %v3326_v57 = vpack.c.bf16 %v2662_v56, %v2661_v55  ;;  %v3338_v60 = vpack.c.bf16 %v2674_v59, %v2673_v58  ;;  %v2675_v61 = vld [vmem:[%s4185_s2 + $0xb0] sm:$0xff]  ;;  %v2676_v62 = vld [vmem:[%s4185_s2 + $0xb8] sm:$0xff]  ;;  %v2656_v0 = vld [vmem:[%s4187_s4 + $0x2] ss:$0 sm:$0xff] }
   0xe   :  { %3295 = vmatprep.subr.bf16.mxu0 %v3294_v17  ;;  %3307 = vmatprep.subr.bf16.mxu1 %v3306_v36  ;;  %v3342_v63 = vpack.c.bf16 %v2676_v62, %v2675_v61  ;;  %v2642_v1 = vld [vmem:[%s4187_s4] ss:$0 sm:$0xff]  ;;  %vm3778_vm5 = vmpackc.low %vm652_vm4, %vm652_vm4  ;;  %v2670_v11 = vld [vmem:[%s4187_s4 + $0x4] ss:$0 sm:$0xff] }
   0xf   :  { %v2663_v19 = vld [vmem:[%s4187_s4 + $0x3] ss:$0 sm:$0xff]  ;;  %v2649_v29 = vld [vmem:[%s4187_s4 + $0x1] ss:$0 sm:$0xff]  ;;  %v3809_v35 = vld [vmem:[%s4184_s1 + $0x18] sm:$0xff] }
  0x10   :  { %v888_v61 = vld [vmem:[%s4186_s3] sm:$0xff]  ;;  %v889_v62 = vld [vmem:[%s4186_s3 + $0x8] sm:$0xff] }
  0x11   :  { %3297 = vmatpush3.bf16.msra.mxu0 %v3294_v17 }
  0x12   :  { %3315 = vmatprep.subr.bf16.mxu0 %v3314_v20 }
  0x81   :  { %v44_v23 = vpop.permute.xlu0 %43 }
  0x82   :  { %vm48_vm1 = vcmp.eq.s32.totalorder %v44_v23, %v41_v22 }
  0x83   :  { %v2638_v25 = vsel %vm48_vm1, 1.0, %v3593_v24 }
  0x84   :  { %2992 = vmatprep.mubr.msk.f32.mxu0 %vm54_vm0, %v2638_v25  ;;  %v2677_v25 = vld [vmem:[%s4187_s4 + $0x5] ss:$0 sm:$0xff] }
  0x85   :  { %v47_v26 = vpop.permute.xlu0 %46 }
  0x86   :  { %vm49_vm2 = vcmp.eq.s32.totalorder %v47_v26, %v41_v22 }
  0x87   :  { %v2639_v27 = vsel %vm49_vm2, 1.0, %v3593_v24 }
  0x88   :  { %2993 = vmatmul.mubr.msk.f32.vlgmr.msra.gmra.mrb[0].mxu0 %vm54_vm0, %v2639_v27 }
  0x89   :  { %3317 = vmatpush3.bf16.msra.mxu0 %v3314_v20 }
  0x8a   :  { %3319 = vmatprep.subr.bf16.mxu0 %v3318_v33 }
  0x8d   :  { %3321 = vmatpush3.bf16.msra.mxu0 %v3318_v33 }
  0x8e   :  { %3331 = vmatprep.subr.bf16.mxu0 %v3330_v39 }
 0x15b   :  { %v2994_v42 = vpop.f32.mrb[0].mxu0 }
 0x15c   :  { %v127_v44 = vpop.f32.mrb[1].mxu0  ;;  %v3720_v49 = vadd.f32 %v2994_v42, %v25_v41  ;;  %v3821_v41 = vld [vmem:[%s4184_s1 + $0x28] sm:$0xff]  ;;  %v3826_v42 = vld [vmem:[%s4184_s1 + $0x20] sm:$0xff] }
 0x15d   :  { %v3718_v48 = vadd.f32 %v127_v44, %v24_v40 }
 0x15f   :  { %3003 = vmatprep.mubr.msk.f32.mxu1 %vm145_vm3, %v3718_v48  ;;  %3025 = vmatprep.mubr.msk.f32.mxu0 %vm145_vm3, %v3718_v48 }
 0x160   :  { %3004 = vmatmul.mubr.msk.f32.vlgmr.msra.gmra.mrb[0].mxu1 %vm145_vm3, %v3720_v49  ;;  %3026 = vmatmul.mubr.msk.f32.vlgmr.msra.gmra.mrb[2].mxu0 %vm145_vm3, %v3720_v49 }
 0x161   :  { %3309 = vmatpush3.bf16.msra.mxu1 %v3306_v36  ;;  %3333 = vmatpush3.bf16.msra.mxu0 %v3330_v39  ;;  %v3814_v36 = vld [vmem:[%s4184_s1 + $0x10] sm:$0xff] }
 0x162   :  { %3014 = vmatprep.mubr.msk.f32.mxu1 %vm145_vm3, %v3718_v48  ;;  %3047 = vmatprep.mubr.msk.f32.mxu0 %vm145_vm3, %v3718_v48 }
 0x163   :  { %3311 = vmatprep.subr.bf16.mxu1 %v3310_v50  ;;  %3335 = vmatprep.subr.bf16.mxu0 %v3334_v51 }
 0x165   :  { %3313 = vmatpush3.bf16.msra.mxu1 %v3310_v50  ;;  %3337 = vmatpush3.bf16.msra.mxu0 %v3334_v51 }
 0x166   :  { %3323 = vmatprep.subr.bf16.mxu1 %v3322_v54 }
 0x168   :  { %3015 = vmatmul.mubr.msk.f32.vlgmr.msra.gmra.mrb[2].mxu1 %vm145_vm3, %v3720_v49  ;;  %3048 = vmatmul.mubr.msk.f32.vlgmr.msra.gmra.mrb[4].mxu0 %vm145_vm3, %v3720_v49 }
 0x169   :  { %3325 = vmatpush3.bf16.msra.mxu1 %v3322_v54  ;;  %3036 = vmatprep.mubr.msk.f32.mxu1 %vm145_vm3, %v3718_v48 }
 0x16a   :  { %3327 = vmatprep.subr.bf16.mxu1 %v3326_v57 }
 0x16d   :  { %3329 = vmatpush3.bf16.msra.mxu1 %v3326_v57 }
 0x16e   :  { %3339 = vmatprep.subr.bf16.mxu1 %v3338_v60 }
 0x170   :  { %3037 = vmatmul.mubr.msk.f32.vlgmr.msra.gmra.mrb[4].mxu1 %vm145_vm3, %v3720_v49 }
 0x171   :  { %3341 = vmatpush3.bf16.msra.mxu1 %v3338_v60  ;;  %3058 = vmatprep.mubr.msk.f32.mxu1 %vm145_vm3, %v3718_v48 }
 0x172   :  { %3343 = vmatprep.subr.bf16.mxu1 %v3342_v63 }
 0x175   :  { %3345 = vmatpush3.bf16.msra.mxu1 %v3342_v63  ;;  %v3366_v63 = vpack.c.bf16 %v889_v62, %v888_v61 }
 0x178   :  { %3059 = vmatmul.mubr.msk.f32.vlgmr.msra.gmra.mrb[6].mxu1 %vm145_vm3, %v3720_v49 }
 0x233   :  { %v3005_v2 = vpop.f32.mrb[0].mxu1  ;;  %v3027_v3 = vpop.f32.mrb[2].mxu0 }
 0x234   :  { %v394_v4 = vadd.f32 %v3027_v3, %v2656_v0  ;;  %v218_v5 = vpop.f32.mrb[1].mxu1  ;;  %v388_v6 = vpop.f32.mrb[3].mxu0  ;;  %v224_v31 = vadd.f32 %v3005_v2, %v2642_v1 }
 0x235   :  { %v219_v7 = vadd.f32 %v2642_v1, %v218_v5  ;;  %v389_v8 = vadd.f32 %v2656_v0, %v388_v6 }
 0x237   :  { %v3346_v10 = vpack.c.bf16 %v394_v4, %v389_v8  ;;  %3069 = vmatprep.mubr.msk.f32.mxu0 %vm652_vm4, %v219_v7 }
 0x239   :  { %3348 = vmatprep.subr.msk.bf16.mxu0 %vm3778_vm5, %v3346_v10 }
 0x23a   :  { %3351 = vmatpush3.bf16.xpose.msk.msra.mxu0 %vm3778_vm5, %v3346_v10 }
 0x23b   :  { %v3016_v12 = vpop.f32.mrb[2].mxu1  ;;  %v3049_v13 = vpop.f32.mrb[4].mxu0 }
 0x23c   :  { %v564_v14 = vadd.f32 %v3049_v13, %v2670_v11  ;;  %v303_v15 = vpop.f32.mrb[3].mxu1  ;;  %v558_v16 = vpop.f32.mrb[5].mxu0  ;;  %v309_v34 = vadd.f32 %v3016_v12, %v2649_v29  ;;  %v977_v13 = vld [vmem:[%s4186_s3 + $0x10] sm:$0xff] }
 0x23d   :  { %v559_v17 = vadd.f32 %v2670_v11, %v558_v16  ;;  %v304_v33 = vadd.f32 %v2649_v29, %v303_v15 }
 0x23f   :  { %v3358_v18 = vpack.c.bf16 %v564_v14, %v559_v17  ;;  %v978_v14 = vld [vmem:[%s4186_s3 + $0x18] sm:$0xff] }
 0x240   :  { %v3370_v15 = vpack.c.bf16 %v978_v14, %v977_v13  ;;  %v2699_v14 = vld [vmem:[%s4187_s4 + $0x7] ss:$0 sm:$0xff] }
 0x241   :  { %3359 = vmatprep.subr.bf16.mxu1 %v3358_v18 }
 0x242   :  { %3361 = vmatpush3.bf16.msra.mxu1 %v3358_v18 }
 0x243   :  { %v3038_v20 = vpop.f32.mrb[4].mxu1 }
 0x244   :  { %v479_v21 = vadd.f32 %v3038_v20, %v2663_v19  ;;  %v473_v22 = vpop.f32.mrb[5].mxu1  ;;  %v2694_v20 = vld [vmem:[%s4187_s4 + $0x6] ss:$0 sm:$0xff] }
 0x245   :  { %v474_v23 = vadd.f32 %v2663_v19, %v473_v22 }
 0x247   :  { %v3352_v24 = vpack.c.bf16 %v479_v21, %v474_v23 }
 0x249   :  { %3354 = vmatprep.subr.msk.bf16.mxu0 %vm3778_vm5, %v3352_v24 }
 0x24a   :  { %3357 = vmatpush3.bf16.xpose.msk.msra.mxu0 %vm3778_vm5, %v3352_v24 }
 0x24b   :  { %v3060_v26 = vpop.f32.mrb[6].mxu1 }
 0x24c   :  { %v649_v27 = vadd.f32 %v3060_v26, %v2677_v25  ;;  %v643_v28 = vpop.f32.mrb[7].mxu1 }
 0x24d   :  { %v644_v30 = vadd.f32 %v2677_v25, %v643_v28 }
 0x24f   :  { %v3362_v32 = vpack.c.bf16 %v649_v27, %v644_v30 }
 0x251   :  { %3070 = vmatmul.mubr.msk.f32.vlgmr.msra.gmra.mrb[6].mxu0 %vm652_vm4, %v224_v31  ;;  %3363 = vmatprep.subr.bf16.mxu1 %v3362_v32 }
 0x252   :  { %3072 = vmatprep.mubr.msk.f32.mxu0 %vm652_vm4, %v304_v33  ;;  %3365 = vmatpush3.bf16.msra.mxu1 %v3362_v32 }
 0x253   :  { %3367 = vmatprep.subr.bf16.mxu1 %v3366_v63 }
 0x255   :  { %3073 = vmatmul.mubr.msk.f32.gmra.mrb[8].mxu0 %vm652_vm4, %v309_v34 }
 0x324   :  { %v3071_v37 = vpop.f32.mrb[6].mxu0 }
 0x325   :  { %v749_v38 = vadd.f32 %v3071_v37, %v3809_v35  ;;  %v743_v39 = vpop.f32.mrb[7].mxu0 }
 0x326   :  { %v744_v40 = vadd.f32 %v743_v39, %v3814_v36 }
 0x327   :  { %v764_v43 = vmul.f32 1.442695, %v749_v38 }
 0x328   :  { %v762_v44 = vmul.f32 1.442695, %v744_v40  ;;  %v3074_v45 = vpop.f32.mrb[8].mxu0  ;;  %v1106_v40 = vld [vmem:[%s4186_s3 + $0x28] sm:$0xff] }
 0x329   :  { %v759_v46 = vadd.f32 %v3074_v45, %v3821_v41  ;;  %v753_v47 = vpop.f32.mrb[9].mxu0  ;;  %v1108_v45 = vld [vmem:[%s4186_s3 + $0x38] sm:$0xff] }
 0x32a   :  { %3520 = vpow2.f32 %v762_v44  ;;  %v754_v50 = vadd.f32 %v753_v47, %v3826_v42  ;;  %v1107_v44 = vld [vmem:[%s4186_s3 + $0x30] sm:$0xff]  ;;  %v1197_v47 = vld [vmem:[%s4186_s3 + $0x40] sm:$0xff] }
 0x32b   :  { %3522 = vpow2.f32 %v764_v43  ;;  %v768_v51 = vmul.f32 1.442695, %v759_v46  ;;  %v3378_v46 = vpack.c.bf16 %v1108_v45, %v1107_v44  ;;  %v2723_v44 = vld [vmem:[%s4185_s2 + $0x100] sm:$0xff] }
 0x32c   :  { %v766_v52 = vmul.f32 1.442695, %v754_v50  ;;  %v1198_v50 = vld [vmem:[%s4186_s3 + $0x48] sm:$0xff] }
 0x32e   :  { %3524 = vpow2.f32 %v766_v52  ;;  %v3382_v52 = vpack.c.bf16 %v1198_v50, %v1197_v47  ;;  %v2709_v50 = vld [vmem:[%s4185_s2 + $0xd0] sm:$0xff] }
 0x32f   :  { %3526 = vpow2.f32 %v768_v51  ;;  %v1199_v51 = vld [vmem:[%s4186_s3 + $0x50] sm:$0xff] }
 0x334   :  { %v3521_v53 = vpop.eup %3520 }
 0x335   :  { %v770_v54 = vsel %vm145_vm3, %v3521_v53, 0.0  ;;  %v3523_v55 = vpop.eup %3522 }
 0x336   :  { %771 = vadd.xlane.f32.xlu1 %v770_v54  ;;  %v773_v58 = vsel %vm145_vm3, %v3523_v55, 0.0 }
 0x338   :  { %v3525_v56 = vpop.eup %3524 }
 0x339   :  { %v776_v57 = vsel %vm145_vm3, %v3525_v56, 0.0  ;;  %v3527_v59 = vpop.eup %3526 }
 0x33a   :  { %777 = vadd.xlane.f32.xlu0 %v776_v57  ;;  %774 = vadd.xlane.f32.xlu1 %v773_v58  ;;  %v779_v60 = vsel %vm145_vm3, %v3527_v59, 0.0 }
 0x33e   :  { %780 = vadd.xlane.f32.xlu1 %v779_v60 }
 0x3c3   :  { %v772_v0 = vpop.xlane.xlu1 %771 }
 0x3c4   :  { %3528 = vrcp.f32 %v772_v0 }
 0x3c7   :  { %v778_v1 = vpop.xlane.xlu0 %777  ;;  %v775_v2 = vpop.xlane.xlu1 %774 }
 0x3c8   :  { %3530 = vrcp.f32 %v778_v1  ;;  %v2697_v1 = vld [vmem:[%s4187_s4 + $0x9] ss:$0 sm:$0xff] }
 0x3c9   :  { %3532 = vrcp.f32 %v775_v2 }
 0x3cb   :  { %v781_v3 = vpop.xlane.xlu1 %780 }
 0x3cc   :  { %3534 = vrcp.f32 %v781_v3  ;;  %v2698_v3 = vld [vmem:[%s4187_s4 + $0xa] ss:$0 sm:$0xff] }
 0x3ce   :  { %v3529_v4 = vpop.eup %3528 }
 0x3cf   :  { %v786_v5 = vmul.f32 %v3529_v4, %v3521_v53  ;;  %v1200_v53 = vld [vmem:[%s4186_s3 + $0x58] sm:$0xff] }
 0x3d0   :  { %v3386_v54 = vpack.c.bf16 %v1200_v53, %v1199_v51  ;;  %v2710_v51 = vld [vmem:[%s4185_s2 + $0xd8] sm:$0xff] }
 0x3d1   :  { %3083 = vmatprep.mubr.msk.f32.mxu1 %vm145_vm3, %v786_v5  ;;  %v3402_v53 = vpack.c.bf16 %v2710_v51, %v2709_v50 }
 0x3d2   :  { %v3531_v6 = vpop.eup %3530 }
 0x3d3   :  { %v3533_v7 = vpop.eup %3532  ;;  %v788_v8 = vmul.f32 %v3531_v6, %v3525_v56  ;;  %v1202_v56 = vld [vmem:[%s4186_s3 + $0x68] sm:$0xff] }
 0x3d4   :  { %v787_v10 = vmul.f32 %v3533_v7, %v3523_v55  ;;  %v1201_v55 = vld [vmem:[%s4186_s3 + $0x60] sm:$0xff] }
 0x3d5   :  { %v3390_v57 = vpack.c.bf16 %v1202_v56, %v1201_v55  ;;  %v2715_v56 = vld [vmem:[%s4185_s2 + $0xe0] sm:$0xff] }
 0x3d6   :  { %v3535_v11 = vpop.eup %3534  ;;  %3084 = vmatmul.mubr.msk.f32.vlgmr.msra.gmra.mrb[8].mxu1 %vm145_vm3, %v787_v10 }
 0x3d7   :  { %3086 = vmatprep.mubr.msk.f32.mxu1 %vm145_vm3, %v788_v8  ;;  %v789_v12 = vmul.f32 %v3535_v11, %v3527_v59  ;;  %3369 = vmatpush3.bf16.msra.mxu1 %v3366_v63  ;;  %v1203_v11 = vld [vmem:[%s4186_s3 + $0x70] sm:$0xff] }
 0x3d8   :  { %3371 = vmatprep.subr.bf16.mxu1 %v3370_v15 }
 0x3da   :  { %3087 = vmatmul.mubr.msk.f32.gmra.mrb[10].mxu1 %vm145_vm3, %v789_v12  ;;  %v1204_v12 = vld [vmem:[%s4186_s3 + $0x78] sm:$0xff] }
 0x3db   :  { %v3394_v13 = vpack.c.bf16 %v1204_v12, %v1203_v11 }
 0x4a9   :  { %v3085_v16 = vpop.f32.mrb[8].mxu1 }
 0x4aa   :  { %v868_v17 = vpop.f32.mrb[9].mxu1 }
 0x4ab   :  { %3093 = vmatprep.mubr.msk.f32.mxu1 %vm652_vm4, %v868_v17 }
 0x4ac   :  { %3094 = vmatmul.mubr.msk.f32.vlgmr.msra.gmra.mrb[12].mxu1 %vm652_vm4, %v3085_v16 }
 0x4ad   :  { %3373 = vmatpush3.bf16.msra.mxu1 %v3370_v15  ;;  %v3088_v18 = vpop.f32.mrb[10].mxu1 }
 0x4ae   :  { %v878_v19 = vpop.f32.mrb[11].mxu1  ;;  %3383 = vmatprep.subr.bf16.mxu1 %v3382_v52 }
 0x4af   :  { %3100 = vmatprep.mubr.msk.f32.mxu1 %vm652_vm4, %v878_v19 }
 0x4b4   :  { %3101 = vmatmul.mubr.msk.f32.vlgmr.msra.gmra.mrb[12].mxu1 %vm652_vm4, %v3088_v18 }
 0x4b5   :  { %3385 = vmatpush3.bf16.msra.mxu1 %v3382_v52  ;;  %v2725_v52 = vld [vmem:[%s4185_s2 + $0x110] sm:$0xff] }
 0x4b6   :  { %3387 = vmatprep.subr.bf16.mxu1 %v3386_v54 }
 0x4b9   :  { %3389 = vmatpush3.bf16.msra.mxu1 %v3386_v54  ;;  %v2726_v54 = vld [vmem:[%s4185_s2 + $0x118] sm:$0xff] }
 0x4ba   :  { %3391 = vmatprep.subr.bf16.mxu1 %v3390_v57  ;;  %v3418_v55 = vpack.c.bf16 %v2726_v54, %v2725_v52 }
 0x4bd   :  { %3393 = vmatpush3.bf16.msra.mxu1 %v3390_v57  ;;  %v2716_v57 = vld [vmem:[%s4185_s2 + $0xe8] sm:$0xff] }
 0x4be   :  { %3395 = vmatprep.subr.bf16.mxu1 %v3394_v13 }
 0x4c1   :  { %3397 = vmatpush3.bf16.msra.mxu1 %v3394_v13  ;;  %v2717_v13 = vld [vmem:[%s4185_s2 + $0xf0] sm:$0xff] }
 0x587   :  { %v3102_v21 = vpop.f32.mrb[12].mxu1 }
 0x588   :  { %v1051_v22 = vpop.f32.mrb[13].mxu1  ;;  %v3506_v23 = vadd.f32 %v3102_v21, %v2694_v20  ;;  %v2702_v21 = vld [vmem:[%s4187_s4 + $0x8] ss:$0 sm:$0xff] }
 0x589   :  { %v3507_v24 = vadd.f32 %v2694_v20, %v1051_v22 }
 0x58a   :  { %v1063_v27 = vadd.f32 %v3506_v23, %v3720_v49  ;;  %v1105_v49 = vld [vmem:[%s4186_s3 + $0x20] sm:$0xff] }
 0x58b   :  { %v1062_v25 = vadd.f32 %v3507_v24, %v3718_v48  ;;  %v3374_v43 = vpack.c.bf16 %v1106_v40, %v1105_v49  ;;  %v2707_v40 = vld [vmem:[%s4185_s2 + $0xc0] sm:$0xff] }
 0x58c   :  { %v1069_v28 = vsel %vm145_vm3, %v1063_v27, 0.0 }
 0x58d   :  { %v1066_v26 = vsel %vm145_vm3, %v1062_v25, 0.0  ;;  %3375 = vmatprep.subr.bf16.mxu0 %v3374_v43 }
 0x58e   :  { %1067 = vadd.xlane.f32.xlu1 %v1066_v26  ;;  %3377 = vmatpush3.bf16.msra.mxu0 %v3374_v43  ;;  %v2708_v43 = vld [vmem:[%s4185_s2 + $0xc8] sm:$0xff] }
 0x58f   :  { %3379 = vmatprep.subr.bf16.mxu0 %v3378_v46  ;;  %v3398_v45 = vpack.c.bf16 %v2708_v43, %v2707_v40 }
 0x592   :  { %1070 = vadd.xlane.f32.xlu1 %v1069_v28  ;;  %3381 = vmatpush3.bf16.msra.mxu0 %v3378_v46  ;;  %v2724_v46 = vld [vmem:[%s4185_s2 + $0x108] sm:$0xff] }
 0x593   :  { %v3414_v47 = vpack.c.bf16 %v2724_v46, %v2723_v44  ;;  %3399 = vmatprep.subr.bf16.mxu0 %v3398_v45 }
 0x595   :  { %3415 = vmatprep.subr.bf16.mxu1 %v3414_v47 }
 0x61b   :  { %v1068_v29 = vpop.xlane.xlu1 %1067 }
 0x61c   :  { %v1073_v30 = vmul.f32 0.03125, %v1068_v29 }
 0x61e   :  { %v1075_v31 = vsub.f32 %v1062_v25, %v1073_v30 }
 0x61f   :  { %v1071_v32 = vpop.xlane.xlu1 %1070 }
 0x620   :  { %v1074_v33 = vmul.f32 0.03125, %v1071_v32  ;;  %v1077_v34 = vmul.f32 %v1075_v31, %v1075_v31 }
 0x622   :  { %v1076_v37 = vsub.f32 %v1063_v27, %v1074_v33  ;;  %v1079_v38 = vsel %vm145_vm3, %v1077_v34, 0.0 }
 0x623   :  { %1080 = vadd.xlane.f32.xlu1 %v1079_v38 }
 0x624   :  { %v1078_v39 = vmul.f32 %v1076_v37, %v1076_v37 }
 0x626   :  { %v1082_v48 = vsel %vm145_vm3, %v1078_v39, 0.0 }
 0x627   :  { %1083 = vadd.xlane.f32.xlu1 %v1082_v48 }
 0x6b0   :  { %v1081_v58 = vpop.xlane.xlu1 %1080 }
 0x6b1   :  { %v1085_v59 = vmul.f32 0.03125, %v1081_v58  ;;  %v2739_v58 = vld [vmem:[%s4185_s2 + $0x140] sm:$0xff] }
 0x6b3   :  { %v1087_v60 = vadd.f32 1e-05, %v1085_v59  ;;  %v3406_v59 = vpack.c.bf16 %v2716_v57, %v2715_v56 }
 0x6b4   :  { %v1084_v61 = vpop.xlane.xlu1 %1083 }
 0x6b5   :  { %3536 = vrsqrt.f32 %v1087_v60  ;;  %v1086_v62 = vmul.f32 0.03125, %v1084_v61  ;;  %v2740_v60 = vld [vmem:[%s4185_s2 + $0x148] sm:$0xff] }
 0x6b6   :  { %v3430_v61 = vpack.c.bf16 %v2740_v60, %v2739_v58 }
 0x6b7   :  { %v1088_v63 = vadd.f32 1e-05, %v1086_v62 }
 0x6b9   :  { %3538 = vrsqrt.f32 %v1088_v63 }
 0x6bf   :  { %v3537_v0 = vpop.eup %3536 }
 0x6c0   :  { %v1091_v2 = vmul.f32 %v3537_v0, %v1075_v31 }
 0x6c2   :  { %v1097_v4 = vmul.f32 %v2697_v1, %v1091_v2 }
 0x6c3   :  { %v3539_v5 = vpop.eup %3538 }
 0x6c4   :  { %v1092_v6 = vmul.f32 %v3539_v5, %v1076_v37  ;;  %v1103_v7 = vadd.f32 %v2698_v3, %v1097_v4  ;;  %v2705_v5 = vld [vmem:[%s4187_s4 + $0xb] ss:$0 sm:$0xff] }
 0x6c6   :  { %v1098_v8 = vmul.f32 %v2697_v1, %v1092_v6  ;;  %3111 = vmatprep.mubr.msk.f32.mxu0 %vm145_vm3, %v1103_v7 }
 0x6c8   :  { %v1104_v10 = vadd.f32 %v2698_v3, %v1098_v8 }
 0x6ca   :  { %3112 = vmatmul.mubr.msk.f32.vlgmr.msra.gmra.mrb[10].mxu0 %vm145_vm3, %v1104_v10 }
 0x6cb   :  { %3401 = vmatpush3.bf16.msra.mxu0 %v3398_v45  ;;  %v2744_v45 = vld [vmem:[%s4187_s4 + $0x14] ss:$0 sm:$0xff] }
 0x6cc   :  { %3403 = vmatprep.subr.bf16.mxu0 %v3402_v53 }
 0x6cf   :  { %3405 = vmatpush3.bf16.msra.mxu0 %v3402_v53 }
 0x6d0   :  { %3407 = vmatprep.subr.bf16.mxu0 %v3406_v59 }
 0x79d   :  { %v3113_v15 = vpop.f32.mrb[10].mxu0 }
 0x79e   :  { %v1192_v16 = vadd.f32 %v3113_v15, %v2699_v14  ;;  %v1186_v17 = vpop.f32.mrb[11].mxu0  ;;  %v2718_v15 = vld [vmem:[%s4185_s2 + $0xf8] sm:$0xff] }
 0x79f   :  { %v1187_v18 = vadd.f32 %v2699_v14, %v1186_v17  ;;  %v2742_v17 = vld [vmem:[%s4185_s2 + $0x158] sm:$0xff] }
 0x7a0   :  { %v1196_v20 = vmax.f32 %v1192_v16, 0.0  ;;  %v2741_v16 = vld [vmem:[%s4185_s2 + $0x150] sm:$0xff] }
 0x7a1   :  { %v1195_v19 = vmax.f32 %v1187_v18, 0.0 }
 0x7a3   :  { %3130 = vmatprep.mubr.msk.f32.mxu1 %vm54_vm0, %v1195_v19  ;;  %v3410_v19 = vpack.c.bf16 %v2718_v15, %v2717_v13 }
 0x7a4   :  { %3131 = vmatmul.mubr.msk.f32.vlgmr.msra.gmra.mrb[14].mxu1 %vm54_vm0, %v1196_v20  ;;  %v3434_v20 = vpack.c.bf16 %v2742_v17, %v2741_v16 }
 0x7a5   :  { %3417 = vmatpush3.bf16.msra.mxu1 %v3414_v47 }
 0x7a6   :  { %3419 = vmatprep.subr.bf16.mxu1 %v3418_v55 }
 0x7a9   :  { %3421 = vmatpush3.bf16.msra.mxu1 %v3418_v55  ;;  %v2736_v55 = vld [vmem:[%s4187_s4 + $0x13] ss:$0 sm:$0xff] }
 0x7aa   :  { %3431 = vmatprep.subr.bf16.mxu1 %v3430_v61 }
 0x877   :  { %v3132_v22 = vpop.f32.mrb[14].mxu1 }
 0x878   :  { %v1282_v23 = vpop.f32.mrb[15].mxu1  ;;  %v1288_v24 = vadd.f32 %v3132_v22, %v2702_v21  ;;  %v2732_v22 = vld [vmem:[%s4185_s2 + $0x128] sm:$0xff] }
 0x879   :  { %v1283_v25 = vadd.f32 %v2702_v21, %v1282_v23  ;;  %v2731_v21 = vld [vmem:[%s4185_s2 + $0x120] sm:$0xff] }
 0x87a   :  { %v1292_v28 = vadd.f32 %v1288_v24, %v1104_v10  ;;  %v3422_v23 = vpack.c.bf16 %v2732_v22, %v2731_v21  ;;  %v2733_v24 = vld [vmem:[%s4185_s2 + $0x130] sm:$0xff] }
 0x87b   :  { %v1291_v26 = vadd.f32 %v1283_v25, %v1103_v7  ;;  %v2706_v7 = vld [vmem:[%s4187_s4 + $0xc] ss:$0 sm:$0xff]  ;;  %v2734_v25 = vld [vmem:[%s4185_s2 + $0x138] sm:$0xff] }
 0x87c   :  { %v1298_v29 = vsel %vm145_vm3, %v1292_v28, 0.0 }
 0x87d   :  { %v1295_v27 = vsel %vm145_vm3, %v1291_v26, 0.0 }
 0x87e   :  { %1296 = vadd.xlane.f32.xlu1 %v1295_v27  ;;  %v2747_v27 = vld [vmem:[%s4185_s2 + $0x160] sm:$0xff] }
 0x882   :  { %1299 = vadd.xlane.f32.xlu1 %v1298_v29 }
 0x90b   :  { %v1297_v30 = vpop.xlane.xlu1 %1296 }
 0x90c   :  { %v1301_v31 = vmul.f32 0.03125, %v1297_v30  ;;  %v2749_v30 = vld [vmem:[%s4185_s2 + $0x170] sm:$0xff] }
 0x90e   :  { %v1303_v32 = vsub.f32 %v1291_v26, %v1301_v31  ;;  %v3426_v26 = vpack.c.bf16 %v2734_v25, %v2733_v24  ;;  %v2750_v31 = vld [vmem:[%s4185_s2 + $0x178] sm:$0xff] }
 0x90f   :  { %v1300_v33 = vpop.xlane.xlu1 %1299 }
 0x910   :  { %v1302_v34 = vmul.f32 0.03125, %v1300_v33  ;;  %v1305_v37 = vmul.f32 %v1303_v32, %v1303_v32  ;;  %v2728_v33 = vld [vmem:[%s4187_s4 + $0x12] ss:$0 sm:$0xff] }
 0x912   :  { %v1304_v38 = vsub.f32 %v1292_v28, %v1302_v34  ;;  %v1307_v39 = vsel %vm145_vm3, %v1305_v37, 0.0  ;;  %v2748_v28 = vld [vmem:[%s4185_s2 + $0x168] sm:$0xff]  ;;  %v2712_v34 = vld [vmem:[%s4187_s4 + $0x10] ss:$0 sm:$0xff] }
 0x913   :  { %1308 = vadd.xlane.f32.xlu1 %v1307_v39  ;;  %v3438_v29 = vpack.c.bf16 %v2748_v28, %v2747_v27 }
 0x914   :  { %v1306_v48 = vmul.f32 %v1304_v38, %v1304_v38 }
 0x916   :  { %v1310_v49 = vsel %vm145_vm3, %v1306_v48, 0.0 }
 0x917   :  { %1311 = vadd.xlane.f32.xlu0 %v1310_v49 }
 0x9a0   :  { %v1309_v62 = vpop.xlane.xlu1 %1308 }
 0x9a1   :  { %v1313_v63 = vmul.f32 0.03125, %v1309_v62 }
 0x9a3   :  { %v1315_v0 = vadd.f32 1e-05, %v1313_v63 }
 0x9a4   :  { %v1312_v1 = vpop.xlane.xlu0 %1311 }
 0x9a5   :  { %3540 = vrsqrt.f32 %v1315_v0  ;;  %v1314_v2 = vmul.f32 0.03125, %v1312_v1  ;;  %v2720_v1 = vld [vmem:[%s4187_s4 + $0x11] ss:$0 sm:$0xff] }
 0x9a7   :  { %v1316_v3 = vadd.f32 1e-05, %v1314_v2 }
 0x9a9   :  { %3542 = vrsqrt.f32 %v1316_v3 }
 0x9af   :  { %v3541_v4 = vpop.eup %3540 }
 0x9b0   :  { %v1319_v6 = vmul.f32 %v3541_v4, %v1303_v32  ;;  %v3442_v32 = vpack.c.bf16 %v2750_v31, %v2749_v30 }
 0x9b2   :  { %v1325_v8 = vmul.f32 %v2705_v5, %v1319_v6 }
 0x9b3   :  { %v3543_v10 = vpop.eup %3542 }
 0x9b4   :  { %v3961_v11 = vadd.f32 %v2706_v7, %v1325_v8  ;;  %v1320_v12 = vmul.f32 %v3543_v10, %v1304_v38 }
 0x9b6   :  { %v1326_v14 = vmul.f32 %v2705_v5, %v1320_v12  ;;  %3141 = vmatprep.mubr.msk.f32.mxu0 %vm145_vm3, %v3961_v11  ;;  %3163 = vmatprep.mubr.msk.f32.mxu1 %vm145_vm3, %v3961_v11 }
 0x9b8   :  { %v3979_v18 = vadd.f32 %v2706_v7, %v1326_v14 }
 0x9ba   :  { %3142 = vmatmul.mubr.msk.f32.vlgmr.msra.gmra.mrb[12].mxu0 %vm145_vm3, %v3979_v18  ;;  %3164 = vmatmul.mubr.msk.f32.vlgmr.msra.gmra.mrb[16].mxu1 %vm145_vm3, %v3979_v18 }
 0x9bb   :  { %3409 = vmatpush3.bf16.msra.mxu0 %v3406_v59  ;;  %3433 = vmatpush3.bf16.msra.mxu1 %v3430_v61  ;;  %v2752_v61 = vld [vmem:[%s4187_s4 + $0x15] ss:$0 sm:$0xff] }
 0x9bc   :  { %3152 = vmatprep.mubr.msk.f32.mxu0 %vm145_vm3, %v3961_v11  ;;  %3185 = vmatprep.mubr.msk.f32.mxu1 %vm145_vm3, %v3961_v11 }
 0x9bd   :  { %3411 = vmatprep.subr.bf16.mxu0 %v3410_v19  ;;  %3435 = vmatprep.subr.bf16.mxu1 %v3434_v20 }
 0x9bf   :  { %3413 = vmatpush3.bf16.msra.mxu0 %v3410_v19  ;;  %3437 = vmatpush3.bf16.msra.mxu1 %v3434_v20 }
 0x9c0   :  { %3423 = vmatprep.subr.bf16.mxu0 %v3422_v23 }
 0x9c2   :  { %3153 = vmatmul.mubr.msk.f32.vlgmr.msra.gmra.mrb[14].mxu0 %vm145_vm3, %v3979_v18  ;;  %3186 = vmatmul.mubr.msk.f32.vlgmr.msra.gmra.mrb[18].mxu1 %vm145_vm3, %v3979_v18 }
 0x9c3   :  { %3425 = vmatpush3.bf16.msra.mxu0 %v3422_v23  ;;  %3174 = vmatprep.mubr.msk.f32.mxu0 %vm145_vm3, %v3961_v11 }
 0x9c4   :  { %3427 = vmatprep.subr.bf16.mxu0 %v3426_v26 }
 0x9c7   :  { %3429 = vmatpush3.bf16.msra.mxu0 %v3426_v26  ;;  %v2769_v26 = vld [vmem:[%s4186_s3 + $0x88] sm:$0xff] }
 0x9c8   :  { %3439 = vmatprep.subr.bf16.mxu0 %v3438_v29 }
 0x9ca   :  { %3175 = vmatmul.mubr.msk.f32.vlgmr.msra.gmra.mrb[16].mxu0 %vm145_vm3, %v3979_v18 }
 0x9cb   :  { %3441 = vmatpush3.bf16.msra.mxu0 %v3438_v29  ;;  %3196 = vmatprep.mubr.msk.f32.mxu0 %vm145_vm3, %v3961_v11 }
 0x9cc   :  { %3443 = vmatprep.subr.bf16.mxu0 %v3442_v32 }
 0x9cf   :  { %3445 = vmatpush3.bf16.msra.mxu0 %v3442_v32 }
 0x9d2   :  { %3197 = vmatmul.mubr.msk.f32.vlgmr.msra.gmra.mrb[18].mxu0 %vm145_vm3, %v3979_v18 }
 0xa8d   :  { %v3143_v37 = vpop.f32.mrb[12].mxu0  ;;  %v3165_v38 = vpop.f32.mrb[16].mxu1 }
 0xa8e   :  { %v1592_v39 = vadd.f32 %v3165_v38, %v2728_v33  ;;  %v1416_v48 = vpop.f32.mrb[13].mxu0  ;;  %v1586_v49 = vpop.f32.mrb[17].mxu1  ;;  %v1422_v3 = vadd.f32 %v3143_v37, %v2712_v34 }
 0xa8f   :  { %v1417_v40 = vadd.f32 %v2712_v34, %v1416_v48  ;;  %v1587_v43 = vadd.f32 %v2728_v33, %v1586_v49 }
 0xa91   :  { %v3446_v44 = vpack.c.bf16 %v1592_v39, %v1587_v43  ;;  %3207 = vmatprep.mubr.msk.f32.mxu1 %vm652_vm4, %v1417_v40  ;;  %v2773_v40 = vld [vmem:[%s4186_s3 + $0x90] sm:$0xff]  ;;  %v2774_v43 = vld [vmem:[%s4186_s3 + $0x98] sm:$0xff] }
 0xa93   :  { %3448 = vmatprep.subr.msk.bf16.mxu1 %vm3778_vm5, %v3446_v44 }
 0xa94   :  { %3451 = vmatpush3.bf16.xpose.msk.msra.mxu1 %vm3778_vm5, %v3446_v44  ;;  %v3470_v44 = vpack.c.bf16 %v2774_v43, %v2773_v40 }
 0xa95   :  { %v3154_v46 = vpop.f32.mrb[14].mxu0  ;;  %v3187_v47 = vpop.f32.mrb[18].mxu1 }
 0xa96   :  { %v1762_v50 = vadd.f32 %v3187_v47, %v2744_v45  ;;  %v1501_v51 = vpop.f32.mrb[15].mxu0  ;;  %v1756_v52 = vpop.f32.mrb[19].mxu1  ;;  %v1507_v6 = vadd.f32 %v3154_v46, %v2720_v1 }
 0xa97   :  { %v1757_v53 = vadd.f32 %v2744_v45, %v1756_v52  ;;  %v1502_v5 = vadd.f32 %v2720_v1, %v1501_v51  ;;  %v2772_v51 = vld [vmem:[%s4187_s4 + $0x16] ss:$0 sm:$0xff] }
 0xa99   :  { %v3458_v54 = vpack.c.bf16 %v1762_v50, %v1757_v53 }
 0xa9b   :  { %3459 = vmatprep.subr.bf16.mxu0 %v3458_v54 }
 0xa9c   :  { %3461 = vmatpush3.bf16.msra.mxu0 %v3458_v54 }
 0xa9d   :  { %v3176_v56 = vpop.f32.mrb[16].mxu0 }
 0xa9e   :  { %v1677_v57 = vadd.f32 %v3176_v56, %v2736_v55  ;;  %v1671_v58 = vpop.f32.mrb[17].mxu0 }
 0xa9f   :  { %v1672_v59 = vadd.f32 %v2736_v55, %v1671_v58 }
 0xaa1   :  { %v3452_v60 = vpack.c.bf16 %v1677_v57, %v1672_v59 }
 0xaa3   :  { %3454 = vmatprep.subr.msk.bf16.mxu1 %vm3778_vm5, %v3452_v60 }
 0xaa4   :  { %3457 = vmatpush3.bf16.xpose.msk.msra.mxu1 %vm3778_vm5, %v3452_v60 }
 0xaa5   :  { %v3198_v62 = vpop.f32.mrb[18].mxu0 }
 0xaa6   :  { %v1847_v63 = vadd.f32 %v3198_v62, %v2752_v61  ;;  %v1841_v0 = vpop.f32.mrb[19].mxu0 }
 0xaa7   :  { %v1842_v2 = vadd.f32 %v2752_v61, %v1841_v0 }
 0xaa9   :  { %v3462_v4 = vpack.c.bf16 %v1847_v63, %v1842_v2 }
 0xaab   :  { %3208 = vmatmul.mubr.msk.f32.vlgmr.msra.gmra.mrb[20].mxu1 %vm652_vm4, %v1422_v3  ;;  %3463 = vmatprep.subr.bf16.mxu0 %v3462_v4 }
 0xaac   :  { %3210 = vmatprep.mubr.msk.f32.mxu1 %vm652_vm4, %v1502_v5  ;;  %3465 = vmatpush3.bf16.msra.mxu0 %v3462_v4  ;;  %v2782_v5 = vld [vmem:[%s4186_s3 + $0xa8] sm:$0xff] }
 0xaaf   :  { %3211 = vmatmul.mubr.msk.f32.gmra.mrb[22].mxu1 %vm652_vm4, %v1507_v6 }
 0xb7e   :  { %v3209_v9 = vpop.f32.mrb[20].mxu1 }
 0xb7f   :  { %v1946_v7 = vadd.f32 %v3209_v9, %v3809_v35  ;;  %v1940_v8 = vpop.f32.mrb[21].mxu1  ;;  %v2783_v9 = vld [vmem:[%s4186_s3 + $0xb0] sm:$0xff] }
 0xb80   :  { %v1941_v10 = vadd.f32 %v1940_v8, %v3814_v36 }
 0xb81   :  { %v1961_v12 = vmul.f32 1.442695, %v1946_v7  ;;  %v2784_v7 = vld [vmem:[%s4186_s3 + $0xb8] sm:$0xff] }
 0xb82   :  { %v1959_v13 = vmul.f32 1.442695, %v1941_v10  ;;  %v3212_v14 = vpop.f32.mrb[22].mxu1  ;;  %v3478_v8 = vpack.c.bf16 %v2784_v7, %v2783_v9  ;;  %v2789_v10 = vld [vmem:[%s4186_s3 + $0xc0] sm:$0xff] }
 0xb83   :  { %3544 = vpow2.f32 %v1961_v12  ;;  %v1956_v15 = vadd.f32 %v3212_v14, %v3821_v41  ;;  %v1950_v16 = vpop.f32.mrb[23].mxu1  ;;  %v2790_v12 = vld [vmem:[%s4186_s3 + $0xc8] sm:$0xff] }
 0xb84   :  { %3546 = vpow2.f32 %v1959_v13  ;;  %v1951_v17 = vadd.f32 %v1950_v16, %v3826_v42  ;;  %v2768_v42 = vld [vmem:[%s4186_s3 + $0x80] sm:$0xff]  ;;  %v2791_v13 = vld [vmem:[%s4186_s3 + $0xd0] sm:$0xff]  ;;  %v3482_v14 = vpack.c.bf16 %v2790_v12, %v2789_v10 }
 0xb85   :  { %v1965_v19 = vmul.f32 1.442695, %v1956_v15  ;;  %v3466_v27 = vpack.c.bf16 %v2769_v26, %v2768_v42  ;;  %v2792_v15 = vld [vmem:[%s4186_s3 + $0xd8] sm:$0xff] }
 0xb86   :  { %v1963_v20 = vmul.f32 1.442695, %v1951_v17  ;;  %v3486_v16 = vpack.c.bf16 %v2792_v15, %v2791_v13  ;;  %v2793_v17 = vld [vmem:[%s4186_s3 + $0xe0] sm:$0xff] }
 0xb87   :  { %3548 = vpow2.f32 %v1965_v19  ;;  %3467 = vmatprep.subr.bf16.mxu0 %v3466_v27  ;;  %v2794_v19 = vld [vmem:[%s4186_s3 + $0xe8] sm:$0xff] }
 0xb88   :  { %3550 = vpow2.f32 %v1963_v20  ;;  %v3490_v20 = vpack.c.bf16 %v2794_v19, %v2793_v17  ;;  %v2804_v19 = vld [vmem:[%s4187_s4 + $0x1c] ss:$0 sm:$0xff] }
 0xb8d   :  { %v3545_v21 = vpop.eup %3544 }
 0xb8e   :  { %v3547_v22 = vpop.eup %3546  ;;  %v1970_v35 = vsel %vm145_vm3, %v3545_v21, 0.0 }
 0xb8f   :  { %1971 = vadd.xlane.f32.xlu0 %v1970_v35  ;;  %v1967_v36 = vsel %vm145_vm3, %v3547_v22, 0.0 }
 0xb90   :  { %1968 = vadd.xlane.f32.xlu1 %v1967_v36 }
 0xb91   :  { %v3549_v23 = vpop.eup %3548 }
 0xb92   :  { %v3551_v24 = vpop.eup %3550  ;;  %v1976_v41 = vsel %vm145_vm3, %v3549_v23, 0.0 }
 0xb93   :  { %1977 = vadd.xlane.f32.xlu0 %v1976_v41  ;;  %v1973_v25 = vsel %vm145_vm3, %v3551_v24, 0.0 }
 0xb94   :  { %1974 = vadd.xlane.f32.xlu1 %v1973_v25  ;;  %v2779_v25 = vld [vmem:[%s4187_s4 + $0x19] ss:$0 sm:$0xff] }
 0xc1c   :  { %v1972_v28 = vpop.xlane.xlu0 %1971 }
 0xc1d   :  { %3552 = vrcp.f32 %v1972_v28  ;;  %v1969_v29 = vpop.xlane.xlu1 %1968  ;;  %v2780_v28 = vld [vmem:[%s4187_s4 + $0x1a] ss:$0 sm:$0xff] }
 0xc1e   :  { %3554 = vrcp.f32 %v1969_v29 }
 0xc20   :  { %v1978_v30 = vpop.xlane.xlu0 %1977 }
 0xc21   :  { %3556 = vrcp.f32 %v1978_v30  ;;  %v1975_v31 = vpop.xlane.xlu1 %1974 }
 0xc22   :  { %3558 = vrcp.f32 %v1975_v31 }
 0xc27   :  { %v3553_v32 = vpop.eup %3552 }
 0xc28   :  { %v3555_v33 = vpop.eup %3554  ;;  %v1984_v37 = vmul.f32 %v3553_v32, %v3545_v21 }
 0xc29   :  { %v1983_v34 = vmul.f32 %v3555_v33, %v3547_v22  ;;  %v2795_v33 = vld [vmem:[%s4186_s3 + $0xf0] sm:$0xff] }
 0xc2b   :  { %v3557_v38 = vpop.eup %3556  ;;  %3221 = vmatprep.mubr.msk.f32.mxu0 %vm145_vm3, %v1983_v34  ;;  %v2796_v34 = vld [vmem:[%s4186_s3 + $0xf8] sm:$0xff] }
 0xc2c   :  { %v3559_v39 = vpop.eup %3558  ;;  %3222 = vmatmul.mubr.msk.f32.vlgmr.msra.gmra.mrb[20].mxu0 %vm145_vm3, %v1984_v37  ;;  %v1986_v49 = vmul.f32 %v3557_v38, %v3549_v23  ;;  %v3494_v37 = vpack.c.bf16 %v2796_v34, %v2795_v33  ;;  %v2786_v38 = vld [vmem:[%s4187_s4 + $0x17] ss:$0 sm:$0xff] }
 0xc2d   :  { %v1985_v48 = vmul.f32 %v3559_v39, %v3551_v24  ;;  %3469 = vmatpush3.bf16.msra.mxu0 %v3466_v27 }
 0xc2e   :  { %3471 = vmatprep.subr.bf16.mxu0 %v3470_v44 }
 0xc2f   :  { %3224 = vmatprep.mubr.msk.f32.mxu0 %vm145_vm3, %v1985_v48 }
 0xc30   :  { %3225 = vmatmul.mubr.msk.f32.gmra.mrb[22].mxu0 %vm145_vm3, %v1986_v49 }
 0xcff   :  { %v3223_v45 = vpop.f32.mrb[20].mxu0 }
 0xd00   :  { %v2065_v46 = vpop.f32.mrb[21].mxu0 }
 0xd01   :  { %3231 = vmatprep.mubr.msk.f32.mxu0 %vm652_vm4, %v2065_v46 }
 0xd02   :  { %3232 = vmatmul.mubr.msk.f32.vlgmr.msra.gmra.mrb[24].mxu0 %vm652_vm4, %v3223_v45  ;;  %v2798_v45 = vld [vmem:[%s4187_s4 + $0x18] ss:$0 sm:$0xff] }
 0xd03   :  { %3473 = vmatpush3.bf16.msra.mxu0 %v3470_v44  ;;  %v3226_v47 = vpop.f32.mrb[22].mxu0 }
 0xd04   :  { %v2075_v50 = vpop.f32.mrb[23].mxu0  ;;  %3483 = vmatprep.subr.bf16.mxu0 %v3482_v14 }
 0xd05   :  { %3238 = vmatprep.mubr.msk.f32.mxu0 %vm652_vm4, %v2075_v50 }
 0xd0a   :  { %3239 = vmatmul.mubr.msk.f32.vlgmr.msra.gmra.mrb[24].mxu0 %vm652_vm4, %v3226_v47 }
 0xd0b   :  { %3485 = vmatpush3.bf16.msra.mxu0 %v3482_v14  ;;  %v2803_v14 = vld [vmem:[%s4187_s4 + $0x1b] ss:$0 sm:$0xff]  ;;  %s3568_s4 = scalar_lea.vmem %s2628_s15, 256 }
 0xd0c   :  { %3487 = vmatprep.subr.bf16.mxu0 %v3486_v16  ;;  %p3569_p0 = scmp.ne.s32.totalorder %s2628_s15, %s3568_s4  ;;  %p3574_p2 = scmp.lt.s32.totalorder %s3568_s4, %s3568_s4 }
 0xd0e   :  { %p3575_p3 = por %p3574_p2, %p3573_p1 }
 0xd0f   :  { %3489 = vmatpush3.bf16.msra.mxu0 %v3486_v16 }
 0xd10   :  { %3491 = vmatprep.subr.bf16.mxu0 %v3490_v20  ;;  %p3576_p4 = pnand %p3575_p3, %p3569_p0 }
 0xd13   :  { %3493 = vmatpush3.bf16.msra.mxu0 %v3490_v20 }
 0xd14   :  { %3495 = vmatprep.subr.bf16.mxu0 %v3494_v37 }
 0xd17   :  { %3497 = vmatpush3.bf16.msra.mxu0 %v3494_v37 }
 0xddd   :  { %v3240_v52 = vpop.f32.mrb[24].mxu0 }
 0xdde   :  { %v3508_v53 = vadd.f32 %v3240_v52, %v2772_v51  ;;  %v2249_v54 = vpop.f32.mrb[25].mxu0 }
 0xddf   :  { %v3509_v55 = vadd.f32 %v2772_v51, %v2249_v54 }
 0xde0   :  { %v2261_v56 = vadd.f32 %v3508_v53, %v3979_v18 }
 0xde1   :  { %v2260_v57 = vadd.f32 %v3509_v55, %v3961_v11  ;;  %v2781_v11 = vld [vmem:[%s4186_s3 + $0xa0] sm:$0xff] }
 0xde2   :  { %v2267_v58 = vsel %vm145_vm3, %v2261_v56, 0.0  ;;  %v3474_v6 = vpack.c.bf16 %v2782_v5, %v2781_v11  ;;  %v2533_v11 = vld [vmem:[%s4188_s5 + $0x18] sm:$0xff] }
 0xde3   :  { %2268 = vadd.xlane.f32.xlu0 %v2267_v58  ;;  %v2264_v59 = vsel %vm145_vm3, %v2260_v57, 0.0 }
 0xde4   :  { %2265 = vadd.xlane.f32.xlu1 %v2264_v59  ;;  %3475 = vmatprep.subr.bf16.mxu1 %v3474_v6 }
 0xde5   :  { %3477 = vmatpush3.bf16.msra.mxu1 %v3474_v6 }
 0xde6   :  { %3479 = vmatprep.subr.bf16.mxu1 %v3478_v8 }
 0xde9   :  { %3481 = vmatpush3.bf16.msra.mxu1 %v3478_v8 }
 0xe70   :  { %v2269_v60 = vpop.xlane.xlu0 %2268 }
 0xe71   :  { %v2271_v61 = vmul.f32 0.03125, %v2269_v60  ;;  %v2266_v62 = vpop.xlane.xlu1 %2265 }
 0xe72   :  { %v2270_v63 = vmul.f32 0.03125, %v2266_v62 }
 0xe73   :  { %v2273_v0 = vsub.f32 %v2261_v56, %v2271_v61 }
 0xe74   :  { %v2272_v1 = vsub.f32 %v2260_v57, %v2270_v63 }
 0xe75   :  { %v2275_v2 = vmul.f32 %v2273_v0, %v2273_v0 }
 0xe76   :  { %v2274_v3 = vmul.f32 %v2272_v1, %v2272_v1 }
 0xe77   :  { %v2279_v4 = vsel %vm145_vm3, %v2275_v2, 0.0  ;;  %v2530_v2 = vld [vmem:[%s4188_s5] sm:$0xff] }
 0xe78   :  { %2280 = vadd.xlane.f32.xlu0 %v2279_v4  ;;  %v2276_v18 = vsel %vm145_vm3, %v2274_v3, 0.0  ;;  %v2531_v3 = vld [vmem:[%s4188_s5 + $0x8] sm:$0xff] }
 0xe79   :  { %2277 = vadd.xlane.f32.xlu1 %v2276_v18  ;;  %v3498_v4 = vpack.c.bf16 %v2531_v3, %v2530_v2  ;;  %v2532_v18 = vld [vmem:[%s4188_s5 + $0x10] sm:$0xff] }
 0xe7a   :  { %v3502_v5 = vpack.c.bf16 %v2533_v11, %v2532_v18 }
 0xe7b   :  { %3499 = vmatprep.subr.bf16.mxu1 %v3498_v4 }
 0xf05   :  { %v2281_v21 = vpop.xlane.xlu0 %2280 }
 0xf06   :  { %v2283_v22 = vmul.f32 0.03125, %v2281_v21  ;;  %v2278_v35 = vpop.xlane.xlu1 %2277 }
 0xf07   :  { %v2282_v36 = vmul.f32 0.03125, %v2278_v35 }
 0xf08   :  { %v2285_v23 = vadd.f32 1e-05, %v2283_v22 }
 0xf09   :  { %v2284_v24 = vadd.f32 1e-05, %v2282_v36  ;;  %v2805_v36 = vld [vmem:[%s4188_s5 + $0x20] ss:$0 sm:$0xff] }
 0xf0a   :  { %3560 = vrsqrt.f32 %v2285_v23 }
 0xf0b   :  { %3562 = vrsqrt.f32 %v2284_v24 }
 0xf14   :  { %v3561_v41 = vpop.eup %3560 }
 0xf15   :  { %v3563_v42 = vpop.eup %3562  ;;  %v2289_v26 = vmul.f32 %v3561_v41, %v2273_v0 }
 0xf16   :  { %v2288_v27 = vmul.f32 %v3563_v42, %v2272_v1 }
 0xf17   :  { %v2295_v29 = vmul.f32 %v2779_v25, %v2289_v26 }
 0xf18   :  { %v2294_v30 = vmul.f32 %v2779_v25, %v2288_v27 }
 0xf19   :  { %v2301_v32 = vadd.f32 %v2780_v28, %v2295_v29 }
 0xf1a   :  { %v2300_v31 = vadd.f32 %v2780_v28, %v2294_v30 }
 0xf1c   :  { %3249 = vmatprep.mubr.msk.f32.mxu1 %vm145_vm3, %v2300_v31 }
 0xf1d   :  { %3250 = vmatmul.mubr.msk.f32.vlgmr.msra.gmra.mrb[24].mxu1 %vm145_vm3, %v2301_v32 }
 0xf1e   :  { %3501 = vmatpush3.bf16.msra.mxu1 %v3498_v4 }
 0xf1f   :  { %3503 = vmatprep.subr.bf16.mxu1 %v3502_v5 }
 0xf22   :  { %3505 = vmatpush3.bf16.msra.mxu1 %v3502_v5 }
 0xff0   :  { %v3251_v39 = vpop.f32.mrb[24].mxu1 }
 0xff1   :  { %v2389_v48 = vadd.f32 %v3251_v39, %v2786_v38  ;;  %v2383_v49 = vpop.f32.mrb[25].mxu1 }
 0xff2   :  { %v2384_v40 = vadd.f32 %v2786_v38, %v2383_v49 }
 0xff3   :  { %v2393_v44 = vmax.f32 %v2389_v48, 0.0 }
 0xff4   :  { %v2392_v43 = vmax.f32 %v2384_v40, 0.0 }
 0xff6   :  { %3268 = vmatprep.mubr.msk.f32.mxu0 %vm54_vm0, %v2392_v43 }
 0xff7   :  { %3269 = vmatmul.mubr.msk.f32.vlgmr.msra.gmra.mrb[26].mxu0 %vm54_vm0, %v2393_v44 }
0x10ca   :  { %v3270_v46 = vpop.f32.mrb[26].mxu0 }
0x10cb   :  { %v2485_v47 = vadd.f32 %v3270_v46, %v2798_v45  ;;  %v2479_v50 = vpop.f32.mrb[27].mxu0 }
0x10cc   :  { %v2480_v51 = vadd.f32 %v2798_v45, %v2479_v50 }
0x10cd   :  { %v2489_v52 = vadd.f32 %v2485_v47, %v2301_v32 }
0x10ce   :  { %v2488_v53 = vadd.f32 %v2480_v51, %v2300_v31 }
0x10cf   :  { %v2495_v54 = vsel %vm145_vm3, %v2489_v52, 0.0 }
0x10d0   :  { %2496 = vadd.xlane.f32.xlu0 %v2495_v54  ;;  %v2492_v55 = vsel %vm145_vm3, %v2488_v53, 0.0 }
0x10d1   :  { %2493 = vadd.xlane.f32.xlu1 %v2492_v55 }
0x115d   :  { %v2497_v56 = vpop.xlane.xlu0 %2496 }
0x115e   :  { %v2499_v57 = vmul.f32 0.03125, %v2497_v56  ;;  %v2494_v58 = vpop.xlane.xlu1 %2493 }
0x115f   :  { %v2498_v59 = vmul.f32 0.03125, %v2494_v58 }
0x1160   :  { %v2501_v60 = vsub.f32 %v2489_v52, %v2499_v57 }
0x1161   :  { %v2500_v61 = vsub.f32 %v2488_v53, %v2498_v59 }
0x1162   :  { %v2503_v62 = vmul.f32 %v2501_v60, %v2501_v60 }
0x1163   :  { %v2502_v63 = vmul.f32 %v2500_v61, %v2500_v61 }
0x1164   :  { %v2507_v0 = vsel %vm145_vm3, %v2503_v62, 0.0 }
0x1165   :  { %2508 = vadd.xlane.f32.xlu0 %v2507_v0  ;;  %v2504_v1 = vsel %vm145_vm3, %v2502_v63, 0.0 }
0x1166   :  { %2505 = vadd.xlane.f32.xlu1 %v2504_v1 }
0x11f2   :  { %v2509_v6 = vpop.xlane.xlu0 %2508 }
0x11f3   :  { %v2511_v9 = vmul.f32 0.03125, %v2509_v6  ;;  %v2506_v7 = vpop.xlane.xlu1 %2505 }
0x11f4   :  { %v2510_v8 = vmul.f32 0.03125, %v2506_v7 }
0x11f5   :  { %v2513_v10 = vadd.f32 1e-05, %v2511_v9 }
0x11f6   :  { %v2512_v12 = vadd.f32 1e-05, %v2510_v8 }
0x11f7   :  { %3564 = vrsqrt.f32 %v2513_v10 }
0x11f8   :  { %3566 = vrsqrt.f32 %v2512_v12 }
0x1201   :  { %v3565_v13 = vpop.eup %3564 }
0x1202   :  { %v3567_v15 = vpop.eup %3566  ;;  %v2517_v16 = vmul.f32 %v3565_v13, %v2501_v60 }
0x1203   :  { %v2516_v17 = vmul.f32 %v3567_v15, %v2500_v61 }
0x1204   :  { %v2523_v20 = vmul.f32 %v2803_v14, %v2517_v16 }
0x1205   :  { %v2522_v21 = vmul.f32 %v2803_v14, %v2516_v17 }
0x1206   :  { %v2529_v35 = vadd.f32 %v2804_v19, %v2523_v20 }
0x1207   :  { %v2528_v22 = vadd.f32 %v2804_v19, %v2522_v21 }
0x1209   :  { %3279 = vmatprep.mubr.msk.f32.mxu1 %vm145_vm3, %v2528_v22 }
0x120a   :  { %3280 = vmatmul.mubr.msk.f32.vlgmr.msra.gmra.mrb[26].mxu1 %vm145_vm3, %v2529_v35 }
0x12dd   :  { %v3281_v23 = vpop.f32.mrb[26].mxu1 }
0x12de   :  { %v2617_v24 = vadd.f32 %v3281_v23, %v2805_v36  ;;  %v2611_v41 = vpop.f32.mrb[27].mxu1 }
0x12df   :  { %v2612_v25 = vadd.f32 %v2805_v36, %v2611_v41 }
0x12e0   :  { %2621 = vst [vmem:[#allocation2 + $0x8] sm:$0xff] %v2617_v24 }
0x12e1   :  { %2620 = vst [vmem:[#allocation2] sm:$0xff] %v2612_v25 }
0x12e2   :  { %3579 = shalt.err (!%p3576_p4)
}
0x12e3   :  { %s3580_s5 = scalar_lea.hbm %s4189_s6, 256 }
0x12e4   :  { %p3581_p5 = scmp.ne.s32.totalorder %s4189_s6, %s3580_s5  ;;  %p3584_p6 = scmp.lt.u32.totalorder %s3580_s5, %s4189_s6 }
0x12e6   :  { %p3586_p7 = pnand %p3584_p6, %p3581_p5 }
0x12e8   :  { %3589 = shalt.err (!%p3586_p7)
}
0x12e9   :  { %s3595_s22 = smov 128   ;;  %s3596_s23 = smov 8  }
0x12ea   :  { %2633 = dma.vmem_to_hbm [thread:$0]  %s2628_s15, 256, %s4189_s6, [#allocation3], %s3595_s22, %s3595_s22, %s3596_s23  }
0x12eb   :  { %3590 = dma.done.wait [#allocation3], 256  }
0x12ec   :  { %3591 = vsyncadd [#allocation3], 4294967040 }
0x12ed   :  { %2637 = vsyncpa [#allocation3], 1 }

</bundles_post_ra>
